<compile_context>
chip_gen: v6e
topology: v6e:2x2x1
jax: 0.10.0
libtpu: 0.0.40
codegen_flags: <defaults>
</compile_context>

<pallas_src>
from functools import partial

import numpy as np
import jax
import jax.numpy as jnp
from jax.experimental import pallas as pl
from jax.experimental.pallas import tpu as pltpu

VMEM = pltpu.MemorySpace.VMEM


# --------------------------------------------------------------------------------------
# Static operator construction (numpy, trace-time constants)
# --------------------------------------------------------------------------------------
def dct_matrix(N):
    # dct(x)[k] = 2 * sum_n x[n] * cos(pi*(2n+1)*k / (2N))   (norm=None)
    n = np.arange(N)[None, :]
    k = np.arange(N)[:, None]
    return 2.0 * np.cos(np.pi * (2 * n + 1) * k / (2.0 * N))


def idct_matrix(N):
    # exact linear inverse of dct_matrix (matches the torch fft-based idct, norm=None)
    n = np.arange(N)[:, None]
    k = np.arange(N)[None, :]
    M = np.cos(np.pi * k * (2 * n + 1) / (2.0 * N)) / N
    M[:, 0] = 1.0 / (2.0 * N)
    return M


def make_dct_operators(B, Hh, Wh):
    """(2M, M) stacked right-multiplication operators [DCT; IDCT] acting on the
    (channels, B*Hh*Wh) flattened layout (row-major (b, y, x) on the lane axis)."""
    KD = np.kron(dct_matrix(Hh), dct_matrix(Wh)).T
    KI = np.kron(idct_matrix(Hh), idct_matrix(Wh)).T
    eye = np.eye(B)
    return np.concatenate([np.kron(eye, KD), np.kron(eye, KI)], axis=0).astype(np.float32)


def make_shift_operator(B, Hh, Wh):
    """(M, 9*M) operator: x(C,M) @ op yields the nine zero-padded 3x3-tap shifted copies
    of every pixel, concatenated along lanes (tap order k = dy*3 + dx)."""
    M = B * Hh * Wh
    blocks = []
    for dy in range(3):
        for dx in range(3):
            P = np.zeros((M, M), np.float32)
            for b in range(B):
                for y in range(Hh):
                    for x in range(Wh):
                        sy, sx = y + dy - 1, x + dx - 1
                        if 0 <= sy < Hh and 0 <= sx < Wh:
                            P[b * Hh * Wh + sy * Wh + sx, b * Hh * Wh + y * Wh + x] = 1.0
            blocks.append(P)
    return np.concatenate(blocks, axis=1)


def watermark_indices(Hh, Wh, radius, msg_len):
    # same index selection as torch.nonzero on the radius mask (row-major order)
    cy, cx = Hh // 2, Wh // 2
    yy, xx = np.meshgrid(np.arange(Hh) - cy, np.arange(Wh) - cx, indexing="ij")
    dist = np.sqrt(yy.astype(np.float64) ** 2 + xx.astype(np.float64) ** 2)
    ys, xs = np.nonzero(dist <= radius)
    assert len(ys) >= msg_len, "message longer than #coefficients inside watermark radius"
    return ys[:msg_len], xs[:msg_len]


def make_watermark_selector(B, Hh, Wh, radius, msg_len, strength):
    """(B*L, M) selector so that msg_block @ sel adds strength*message[b, j] to the
    channel-0 row at flattened position (b, ys[j], xs[j])."""
    M = B * Hh * Wh
    ys, xs = watermark_indices(Hh, Wh, radius, msg_len)
    S = np.zeros((B * msg_len, M), np.float32)
    for b in range(B):
        for j in range(msg_len):
            S[b * msg_len + j, b * Hh * Wh + ys[j] * Wh + xs[j]] = strength
    return S


# --------------------------------------------------------------------------------------
# Haar (db1) DWT / IDWT, single level (plain JAX; strided interleave is layout plumbing)
# TODO(synk): pytorch_wavelets' exact db1 band-order/sign convention is approximated by a
#             self-consistent orthonormal Haar forward/inverse pair (roundtrip-exact).
# --------------------------------------------------------------------------------------
def haar_dwt2(x):
    a = x[:, :, 0::2, 0::2]
    b = x[:, :, 0::2, 1::2]
    c = x[:, :, 1::2, 0::2]
    d = x[:, :, 1::2, 1::2]
    LL = 0.5 * (a + b + c + d)
    b0 = 0.5 * (-a - b + c + d)   # band 0 (the one the encoder watermarks)
    b1 = 0.5 * (-a + b - c + d)
    b2 = 0.5 * (a - b - c + d)
    return LL, (b0, b1, b2)


def haar_idwt2(LL, bands):
    b0, b1, b2 = bands
    a = 0.5 * (LL - b0 - b1 + b2)
    bb = 0.5 * (LL - b0 + b1 - b2)
    c = 0.5 * (LL + b0 - b1 - b2)
    d = 0.5 * (LL + b0 + b1 + b2)
    B, C, Hh, Wh = LL.shape
    top = jnp.stack([a, bb], axis=-1).reshape(B, C, Hh, 2 * Wh)
    bot = jnp.stack([c, d], axis=-1).reshape(B, C, Hh, 2 * Wh)
    return jnp.stack([top, bot], axis=-2).reshape(B, C, 2 * Hh, 2 * Wh)


# --------------------------------------------------------------------------------------
# Fused Pallas kernel: DCT -> conv stack -> watermark -> after layer -> 1x1 conv -> IDCT
# --------------------------------------------------------------------------------------
def _make_encoder_kernel(num_bn_layers, blocks_before_wm, M):
    """Ref order: x (C3,M), msg (Cc,B*L), dct_ops (2M,M), shift_op (M,9M), sel (B*L,M),
    [wt_l (9*Cout,Cin), bgb_l (Cout,3)] * num_bn_layers, wf_t (3,Cc), bf (3,1), out (3,M).
    """
    def kernel(*refs):
        x_ref, msg_ref, dct_ref, shift_ref, sel_ref = refs[:5]
        layer_refs = refs[5:5 + 2 * num_bn_layers]
        wf_ref, bf_ref, o_ref = refs[5 + 2 * num_bn_layers:]

        def conv_bn_relu(h, wt_ref, bgb_ref):
            cout = bgb_ref.shape[0]
            # all nine zero-padded 3x3 taps of every pixel in ONE wide MXU matmul
            wide = jnp.dot(h, shift_ref[...], preferred_element_type=jnp.float32)
            wt = wt_ref[...]                                    # (9*cout, cin)
            acc = jnp.dot(wt[0:cout, :], wide[:, 0:M],
                          preferred_element_type=jnp.float32)
            for k in range(1, 9):
                acc = acc + jnp.dot(wt[k * cout:(k + 1) * cout, :],
                                    wide[:, k * M:(k + 1) * M],
                                    preferred_element_type=jnp.float32)
            acc = acc + bgb_ref[:, 0:1]                         # conv bias
            # BatchNorm2d, training-mode batch stats (two-pass biased variance),
            # folded into a single scale/shift epilogue; rsqrt goes to the EUP.
            mean = jnp.mean(acc, axis=1, keepdims=True)
            cen = acc - mean
            var = jnp.mean(cen * cen, axis=1, keepdims=True)
            scale = bgb_ref[:, 1:2] * jax.lax.rsqrt(var + 1e-5)
            return jnp.maximum(cen * scale + bgb_ref[:, 2:3], 0.0)

        # 2D DCT of every (batch, channel) block: one matmul with the kron operator
        h = jnp.dot(x_ref[...], dct_ref[0:M, :], preferred_element_type=jnp.float32)

        li = 0
        for _ in range(blocks_before_wm):                       # conv_layers stack
            h = conv_bn_relu(h, layer_refs[2 * li], layer_refs[2 * li + 1])
            li += 1

        # DCT-domain watermark on channel 0: one tiny selector matmul, added in VMEM
        h = h + jnp.dot(msg_ref[...], sel_ref[...], preferred_element_type=jnp.float32)

        for _ in range(num_bn_layers - blocks_before_wm):       # after_watermark_layer
            h = conv_bn_relu(h, layer_refs[2 * li], layer_refs[2 * li + 1])
            li += 1

        # final 1x1 conv + inverse 2D DCT; output stored lane-dense (3, M)
        y = jnp.dot(wf_ref[...], h, preferred_element_type=jnp.float32) + bf_ref[...]
        o_ref[...] = jnp.dot(y, dct_ref[M:2 * M, :], preferred_element_type=jnp.float32)

    return kernel


def encoder_pallas(x_cm, msg_block, dct_ops, shift_op, sel_op, layer_args, wf_t, bf):
    M = x_cm.shape[1]
    num_bn_layers = len(layer_args) // 2
    kernel = _make_encoder_kernel(num_bn_layers, num_bn_layers - 1, M)
    args = (x_cm, msg_block, dct_ops, shift_op, sel_op, *layer_args, wf_t, bf)
    # TODO(synk): at production sizes (M >> 128) switch to an M-tiled grid with a global
    #             sum/sum-sq BN accumulator instead of whole-array VMEM blocks.
    return pl.pallas_call(
        kernel,
        out_shape=jax.ShapeDtypeStruct((x_cm.shape[0], M), jnp.float32),
        in_specs=[pl.BlockSpec(memory_space=VMEM)] * len(args),
        out_specs=pl.BlockSpec(memory_space=VMEM),
    )(*args)


# --------------------------------------------------------------------------------------
# Parameters (deterministic synthetic init) and forward pass
# --------------------------------------------------------------------------------------
def init_params(key, conv_channels, encoder_blocks):
    keys = jax.random.split(key, encoder_blocks + 2)

    def conv_bn_params(k, cin, cout):
        k1, k2, k3, k4 = jax.random.split(k, 4)
        return dict(
            w=0.1 * jax.random.normal(k1, (3, 3, cin, cout), jnp.float32),
            b=0.1 * jax.random.normal(k2, (cout,), jnp.float32),
            gamma=1.0 + 0.1 * jax.random.normal(k3, (cout,), jnp.float32),
            beta=0.1 * jax.random.normal(k4, (cout,), jnp.float32),
        )

    conv_layers = [conv_bn_params(keys[0], 3, conv_channels)]
    for i in range(1, encoder_blocks):
        conv_layers.append(conv_bn_params(keys[i], conv_channels, conv_channels))
    after = conv_bn_params(keys[encoder_blocks], conv_channels, conv_channels)
    kf1, kf2 = jax.random.split(keys[encoder_blocks + 1])
    final = dict(w=0.1 * jax.random.normal(kf1, (conv_channels, 3), jnp.float32),
                 b=0.1 * jax.random.normal(kf2, (3,), jnp.float32))
    return dict(conv_layers=conv_layers, after=after, final=final)


@partial(jax.jit, static_argnames=("radius", "strength"))
def encoder_forward(params, image, message, *, radius, strength=20.0):
    B, C3, H, W = image.shape
    Hh, Wh = H // 2, W // 2
    M = B * Hh * Wh
    L = message.shape[1]
    conv_channels = params["conv_layers"][0]["w"].shape[-1]

    # 1) Haar DWT; take high band 0 (HH[0][:, :, 0, :, :])
    LL, bands = haar_dwt2(image)
    hh_high = bands[0]                                            # (B, 3, Hh, Wh)

    # kernel data layout: channels on sublanes, all (b, y, x) pixels on 128 dense lanes
    x_cm = jnp.transpose(hh_high, (1, 0, 2, 3)).reshape(C3, M)

    # message -> (conv_channels, B*L): only row 0 (channel 0) carries the message
    msg_row = message.astype(jnp.float32).reshape(1, B * L)
    msg_block = jnp.concatenate(
        [msg_row, jnp.zeros((conv_channels - 1, B * L), jnp.float32)], axis=0)

    # static operators (trace-time numpy constants)
    dct_ops = jnp.asarray(make_dct_operators(B, Hh, Wh))          # (2M, M)
    shift_op = jnp.asarray(make_shift_operator(B, Hh, Wh))        # (M, 9M)
    sel_op = jnp.asarray(make_watermark_selector(B, Hh, Wh, radius, L, strength))

    # per-layer conv weights packed as (9*Cout, Cin); bias/gamma/beta packed as (Cout, 3)
    layer_args = []
    for lp in list(params["conv_layers"]) + [params["after"]]:
        w = lp["w"]                                               # (3, 3, cin, cout)
        cin, cout = w.shape[2], w.shape[3]
        wt = jnp.transpose(w.reshape(9, cin, cout), (0, 2, 1)).reshape(9 * cout, cin)
        bgb = jnp.stack([lp["b"], lp["gamma"], lp["beta"]], axis=1)
        layer_args += [wt, bgb]

    wf_t = jnp.transpose(params["final"]["w"])                    # (3, conv_channels)
    bf = params["final"]["b"].reshape(3, 1)

    # 2-6) fused DCT -> conv stack -> watermark -> after layer -> 1x1 conv -> IDCT
    out_cm = encoder_pallas(x_cm, msg_block, dct_ops, shift_op, sel_op,
                            layer_args, wf_t, bf)

    # 7) put the processed band back and invert the DWT
    im_w = jnp.transpose(out_cm.reshape(C3, B, Hh, Wh), (1, 0, 2, 3))
    return haar_idwt2(LL, (im_w, bands[1], bands[2]))


# --------------------------------------------------------------------------------------
# Pure-JAX reference of the same math (for validation only)
# --------------------------------------------------------------------------------------
def reference_forward(params, image, message, *, radius, strength=20.0):
    B, C3, H, W = image.shape
    Hh, Wh = H // 2, W // 2
    D_h = jnp.asarray(dct_matrix(Hh).astype(np.float32))
    D_w = jnp.asarray(dct_matrix(Wh).astype(np.float32))
    ID_h = jnp.asarray(idct_matrix(Hh).astype(np.float32))
    ID_w = jnp.asarray(idct_matrix(Wh).astype(np.float32))

    LL, bands = haar_dwt2(image)
    x = jnp.einsum("ij,bcjk,lk->bcil", D_h, bands[0], D_w)

    def conv_bn_relu_ref(x, lp):
        w = jnp.transpose(lp["w"], (3, 2, 0, 1))                  # OIHW
        y = jax.lax.conv_general_dilated(
            x, w, (1, 1), ((1, 1), (1, 1)),
            dimension_numbers=("NCHW", "OIHW", "NCHW"))
        y = y + lp["b"][None, :, None, None]
        mean = jnp.mean(y, axis=(0, 2, 3), keepdims=True)
        var = jnp.mean((y - mean) ** 2, axis=(0, 2, 3), keepdims=True)
        y = (y - mean) * jax.lax.rsqrt(var + 1e-5)
        y = y * lp["gamma"][None, :, None, None] + lp["beta"][None, :, None, None]
        return jnp.maximum(y, 0.0)

    for lp in params["conv_layers"]:
        x = conv_bn_relu_ref(x, lp)

    ys, xs = watermark_indices(Hh, Wh, radius, message.shape[1])
    x = x.at[:, 0, ys, xs].add(message * strength)

    x = conv_bn_relu_ref(x, params["after"])
    x = (jnp.einsum("io,bihw->bohw", params["final"]["w"], x)
         + params["final"]["b"][None, :, None, None])
    x = jnp.einsum("ij,bcjk,lk->bcil", ID_h, x, ID_w)
    return haar_idwt2(LL, (x, bands[1], bands[2]))


if __name__ == "__main__":
    # config consistent with the module: H=W=16, encoder_channels=4, encoder_blocks=2,
    # watermark_radius=3, message length 8
    B, H, W = 2, 16, 16
    conv_channels = 4
    encoder_blocks = 2
    watermark_radius = 3.0
    msg_len = 8

    key = jax.random.PRNGKey(0)
    k_img, k_msg, k_par = jax.random.split(key, 3)
    image = jax.random.normal(k_img, (B, 3, H, W), jnp.float32)
    message = jax.random.bernoulli(k_msg, 0.5, (B, msg_len)).astype(jnp.float32)
    params = init_params(k_par, conv_channels, encoder_blocks)

    out = encoder_forward(params, image, message, radius=watermark_radius, strength=20.0)
    out = jax.block_until_ready(out)
    assert out.shape == (B, 3, H, W) and out.dtype == jnp.float32
    assert bool(jnp.all(jnp.isfinite(out)))

    # cross-check the fused kernel against a plain-JAX implementation of the same math
    ref = reference_forward(params, image, message, radius=watermark_radius, strength=20.0)
    ref = jax.block_until_ready(ref)
    max_err = float(jnp.max(jnp.abs(out - ref)))
    assert max_err < 5e-2, f"fused kernel disagrees with reference (max abs err {max_err})"

    print("KERNEL_OK")
</pallas_src>

<mosaic_0001>
module attributes {stable_mosaic.version = 11 : i64} {
  func.func @kernel(%arg0: memref<3x128xf32, #tpu.memory_space<vmem>>, %arg1: memref<4x16xf32, #tpu.memory_space<vmem>>, %arg2: memref<256x128xf32, #tpu.memory_space<vmem>>, %arg3: memref<128x1152xf32, #tpu.memory_space<vmem>>, %arg4: memref<16x128xf32, #tpu.memory_space<vmem>>, %arg5: memref<36x3xf32, #tpu.memory_space<vmem>>, %arg6: memref<4x3xf32, #tpu.memory_space<vmem>>, %arg7: memref<36x4xf32, #tpu.memory_space<vmem>>, %arg8: memref<4x3xf32, #tpu.memory_space<vmem>>, %arg9: memref<36x4xf32, #tpu.memory_space<vmem>>, %arg10: memref<4x3xf32, #tpu.memory_space<vmem>>, %arg11: memref<3x4xf32, #tpu.memory_space<vmem>>, %arg12: memref<3x1xf32, #tpu.memory_space<vmem>>, %arg13: memref<3x128xf32, #tpu.memory_space<vmem>>) attributes {dimension_semantics = [], scalar_prefetch = 0 : i64, scratch_operands = 0 : i64, tpu.core_type = #tpu.core_type<tc>} {
    %c0 = arith.constant 0 : index
    %c0_0 = arith.constant 0 : index
    %0 = vector.load %arg0[%c0, %c0_0] : memref<3x128xf32, #tpu.memory_space<vmem>>, vector<3x128xf32>
    %c0_1 = arith.constant 0 : index
    %c0_2 = arith.constant 0 : index
    %1 = vector.load %arg2[%c0_1, %c0_2] : memref<256x128xf32, #tpu.memory_space<vmem>>, vector<128x128xf32>
    %cst = arith.constant dense<0.000000e+00> : vector<3x128xf32>
    %2 = tpu.matmul %0, %1, %cst {dimension_numbers = #tpu.dot_dimension_numbers<[1], [0], [0], [1], [0, 0, 1, 1], [], []>} : vector<3x128xf32>, vector<128x128xf32>, vector<3x128xf32> -> vector<3x128xf32>
    %c0_3 = arith.constant 0 : index
    %c0_4 = arith.constant 0 : index
    %3 = vector.load %arg3[%c0_3, %c0_4] : memref<128x1152xf32, #tpu.memory_space<vmem>>, vector<128x1152xf32>
    %cst_5 = arith.constant dense<0.000000e+00> : vector<3x1152xf32>
    %4 = tpu.matmul %2, %3, %cst_5 {dimension_numbers = #tpu.dot_dimension_numbers<[1], [0], [0], [1], [0, 0, 1, 1], [], []>} : vector<3x128xf32>, vector<128x1152xf32>, vector<3x1152xf32> -> vector<3x1152xf32>
    %c0_6 = arith.constant 0 : index
    %c0_7 = arith.constant 0 : index
    %5 = vector.load %arg5[%c0_6, %c0_7] : memref<36x3xf32, #tpu.memory_space<vmem>>, vector<36x3xf32>
    %6 = vector.extract_strided_slice %5 {offsets = [0, 0], sizes = [4, 3], strides = [1, 1]} : vector<36x3xf32> to vector<4x3xf32>
    %7 = vector.extract_strided_slice %4 {offsets = [0, 0], sizes = [3, 128], strides = [1, 1]} : vector<3x1152xf32> to vector<3x128xf32>
    %cst_8 = arith.constant dense<0.000000e+00> : vector<4x128xf32>
    %8 = tpu.matmul %6, %7, %cst_8 {dimension_numbers = #tpu.dot_dimension_numbers<[1], [0], [0], [1], [0, 0, 1, 1], [], []>} : vector<4x3xf32>, vector<3x128xf32>, vector<4x128xf32> -> vector<4x128xf32>
    %9 = vector.extract_strided_slice %5 {offsets = [4, 0], sizes = [4, 3], strides = [1, 1]} : vector<36x3xf32> to vector<4x3xf32>
    %10 = vector.extract_strided_slice %4 {offsets = [0, 128], sizes = [3, 128], strides = [1, 1]} : vector<3x1152xf32> to vector<3x128xf32>
    %cst_9 = arith.constant dense<0.000000e+00> : vector<4x128xf32>
    %11 = tpu.matmul %9, %10, %cst_9 {dimension_numbers = #tpu.dot_dimension_numbers<[1], [0], [0], [1], [0, 0, 1, 1], [], []>} : vector<4x3xf32>, vector<3x128xf32>, vector<4x128xf32> -> vector<4x128xf32>
    %12 = arith.addf %8, %11 : vector<4x128xf32>
    %13 = vector.extract_strided_slice %5 {offsets = [8, 0], sizes = [4, 3], strides = [1, 1]} : vector<36x3xf32> to vector<4x3xf32>
    %14 = vector.extract_strided_slice %4 {offsets = [0, 256], sizes = [3, 128], strides = [1, 1]} : vector<3x1152xf32> to vector<3x128xf32>
    %cst_10 = arith.constant dense<0.000000e+00> : vector<4x128xf32>
    %15 = tpu.matmul %13, %14, %cst_10 {dimension_numbers = #tpu.dot_dimension_numbers<[1], [0], [0], [1], [0, 0, 1, 1], [], []>} : vector<4x3xf32>, vector<3x128xf32>, vector<4x128xf32> -> vector<4x128xf32>
    %16 = arith.addf %12, %15 : vector<4x128xf32>
    %17 = vector.extract_strided_slice %5 {offsets = [12, 0], sizes = [4, 3], strides = [1, 1]} : vector<36x3xf32> to vector<4x3xf32>
    %18 = vector.extract_strided_slice %4 {offsets = [0, 384], sizes = [3, 128], strides = [1, 1]} : vector<3x1152xf32> to vector<3x128xf32>
    %cst_11 = arith.constant dense<0.000000e+00> : vector<4x128xf32>
    %19 = tpu.matmul %17, %18, %cst_11 {dimension_numbers = #tpu.dot_dimension_numbers<[1], [0], [0], [1], [0, 0, 1, 1], [], []>} : vector<4x3xf32>, vector<3x128xf32>, vector<4x128xf32> -> vector<4x128xf32>
    %20 = arith.addf %16, %19 : vector<4x128xf32>
    %21 = vector.extract_strided_slice %5 {offsets = [16, 0], sizes = [4, 3], strides = [1, 1]} : vector<36x3xf32> to vector<4x3xf32>
    %22 = vector.extract_strided_slice %4 {offsets = [0, 512], sizes = [3, 128], strides = [1, 1]} : vector<3x1152xf32> to vector<3x128xf32>
    %cst_12 = arith.constant dense<0.000000e+00> : vector<4x128xf32>
    %23 = tpu.matmul %21, %22, %cst_12 {dimension_numbers = #tpu.dot_dimension_numbers<[1], [0], [0], [1], [0, 0, 1, 1], [], []>} : vector<4x3xf32>, vector<3x128xf32>, vector<4x128xf32> -> vector<4x128xf32>
    %24 = arith.addf %20, %23 : vector<4x128xf32>
    %25 = vector.extract_strided_slice %5 {offsets = [20, 0], sizes = [4, 3], strides = [1, 1]} : vector<36x3xf32> to vector<4x3xf32>
    %26 = vector.extract_strided_slice %4 {offsets = [0, 640], sizes = [3, 128], strides = [1, 1]} : vector<3x1152xf32> to vector<3x128xf32>
    %cst_13 = arith.constant dense<0.000000e+00> : vector<4x128xf32>
    %27 = tpu.matmul %25, %26, %cst_13 {dimension_numbers = #tpu.dot_dimension_numbers<[1], [0], [0], [1], [0, 0, 1, 1], [], []>} : vector<4x3xf32>, vector<3x128xf32>, vector<4x128xf32> -> vector<4x128xf32>
    %28 = arith.addf %24, %27 : vector<4x128xf32>
    %29 = vector.extract_strided_slice %5 {offsets = [24, 0], sizes = [4, 3], strides = [1, 1]} : vector<36x3xf32> to vector<4x3xf32>
    %30 = vector.extract_strided_slice %4 {offsets = [0, 768], sizes = [3, 128], strides = [1, 1]} : vector<3x1152xf32> to vector<3x128xf32>
    %cst_14 = arith.constant dense<0.000000e+00> : vector<4x128xf32>
    %31 = tpu.matmul %29, %30, %cst_14 {dimension_numbers = #tpu.dot_dimension_numbers<[1], [0], [0], [1], [0, 0, 1, 1], [], []>} : vector<4x3xf32>, vector<3x128xf32>, vector<4x128xf32> -> vector<4x128xf32>
    %32 = arith.addf %28, %31 : vector<4x128xf32>
    %33 = vector.extract_strided_slice %5 {offsets = [28, 0], sizes = [4, 3], strides = [1, 1]} : vector<36x3xf32> to vector<4x3xf32>
    %34 = vector.extract_strided_slice %4 {offsets = [0, 896], sizes = [3, 128], strides = [1, 1]} : vector<3x1152xf32> to vector<3x128xf32>
    %cst_15 = arith.constant dense<0.000000e+00> : vector<4x128xf32>
    %35 = tpu.matmul %33, %34, %cst_15 {dimension_numbers = #tpu.dot_dimension_numbers<[1], [0], [0], [1], [0, 0, 1, 1], [], []>} : vector<4x3xf32>, vector<3x128xf32>, vector<4x128xf32> -> vector<4x128xf32>
    %36 = arith.addf %32, %35 : vector<4x128xf32>
    %37 = vector.extract_strided_slice %5 {offsets = [32, 0], sizes = [4, 3], strides = [1, 1]} : vector<36x3xf32> to vector<4x3xf32>
    %38 = vector.extract_strided_slice %4 {offsets = [0, 1024], sizes = [3, 128], strides = [1, 1]} : vector<3x1152xf32> to vector<3x128xf32>
    %cst_16 = arith.constant dense<0.000000e+00> : vector<4x128xf32>
    %39 = tpu.matmul %37, %38, %cst_16 {dimension_numbers = #tpu.dot_dimension_numbers<[1], [0], [0], [1], [0, 0, 1, 1], [], []>} : vector<4x3xf32>, vector<3x128xf32>, vector<4x128xf32> -> vector<4x128xf32>
    %40 = arith.addf %36, %39 : vector<4x128xf32>
    %c0_17 = arith.constant 0 : index
    %c0_18 = arith.constant 0 : index
    %41 = vector.load %arg6[%c0_17, %c0_18] : memref<4x3xf32, #tpu.memory_space<vmem>>, vector<4x1xf32>
    %42 = vector.broadcast %41 : vector<4x1xf32> to vector<4x128xf32>
    %43 = arith.addf %40, %42 : vector<4x128xf32>
    %cst_19 = arith.constant dense<0.000000e+00> : vector<4xf32>
    %44 = vector.multi_reduction <add>, %43, %cst_19 [1] : vector<4x128xf32> to vector<4xf32>
    %45 = vector.shape_cast %44 : vector<4xf32> to vector<4x1xf32>
    %cst_20 = arith.constant 1.280000e+02 : f32
    %46 = vector.broadcast %cst_20 : f32 to vector<4x1xf32>
    %47 = arith.divf %45, %46 : vector<4x1xf32>
    %48 = vector.broadcast %47 : vector<4x1xf32> to vector<4x128xf32>
    %49 = arith.subf %43, %48 : vector<4x128xf32>
    %50 = arith.mulf %49, %49 : vector<4x128xf32>
    %cst_21 = arith.constant dense<0.000000e+00> : vector<4xf32>
    %51 = vector.multi_reduction <add>, %50, %cst_21 [1] : vector<4x128xf32> to vector<4xf32>
    %52 = vector.shape_cast %51 : vector<4xf32> to vector<4x1xf32>
    %cst_22 = arith.constant 1.280000e+02 : f32
    %53 = vector.broadcast %cst_22 : f32 to vector<4x1xf32>
    %54 = arith.divf %52, %53 : vector<4x1xf32>
    %c0_23 = arith.constant 0 : index
    %c1 = arith.constant 1 : index
    %55 = vector.load %arg6[%c0_23, %c1] : memref<4x3xf32, #tpu.memory_space<vmem>>, vector<4x1xf32>
    %cst_24 = arith.constant 9.99999974E-6 : f32
    %56 = vector.broadcast %cst_24 : f32 to vector<4x1xf32>
    %57 = arith.addf %54, %56 : vector<4x1xf32>
    %58 = math.rsqrt %57 : vector<4x1xf32>
    %59 = arith.mulf %55, %58 : vector<4x1xf32>
    %60 = vector.broadcast %59 : vector<4x1xf32> to vector<4x128xf32>
    %61 = arith.mulf %49, %60 : vector<4x128xf32>
    %c0_25 = arith.constant 0 : index
    %c2 = arith.constant 2 : index
    %62 = vector.load %arg6[%c0_25, %c2] : memref<4x3xf32, #tpu.memory_space<vmem>>, vector<4x1xf32>
    %63 = vector.broadcast %62 : vector<4x1xf32> to vector<4x128xf32>
    %64 = arith.addf %61, %63 : vector<4x128xf32>
    %cst_26 = arith.constant 0.000000e+00 : f32
    %65 = vector.broadcast %cst_26 : f32 to vector<4x128xf32>
    %66 = arith.maximumf %64, %65 : vector<4x128xf32>
    %c0_27 = arith.constant 0 : index
    %c0_28 = arith.constant 0 : index
    %67 = vector.load %arg3[%c0_27, %c0_28] : memref<128x1152xf32, #tpu.memory_space<vmem>>, vector<128x1152xf32>
    %cst_29 = arith.constant dense<0.000000e+00> : vector<4x1152xf32>
    %68 = tpu.matmul %66, %67, %cst_29 {dimension_numbers = #tpu.dot_dimension_numbers<[1], [0], [0], [1], [0, 0, 1, 1], [], []>} : vector<4x128xf32>, vector<128x1152xf32>, vector<4x1152xf32> -> vector<4x1152xf32>
    %c0_30 = arith.constant 0 : index
    %c0_31 = arith.constant 0 : index
    %69 = vector.load %arg7[%c0_30, %c0_31] : memref<36x4xf32, #tpu.memory_space<vmem>>, vector<36x4xf32>
    %70 = vector.extract_strided_slice %69 {offsets = [0, 0], sizes = [4, 4], strides = [1, 1]} : vector<36x4xf32> to vector<4x4xf32>
    %71 = vector.extract_strided_slice %68 {offsets = [0, 0], sizes = [4, 128], strides = [1, 1]} : vector<4x1152xf32> to vector<4x128xf32>
    %cst_32 = arith.constant dense<0.000000e+00> : vector<4x128xf32>
    %72 = tpu.matmul %70, %71, %cst_32 {dimension_numbers = #tpu.dot_dimension_numbers<[1], [0], [0], [1], [0, 0, 1, 1], [], []>} : vector<4x4xf32>, vector<4x128xf32>, vector<4x128xf32> -> vector<4x128xf32>
    %73 = vector.extract_strided_slice %69 {offsets = [4, 0], sizes = [4, 4], strides = [1, 1]} : vector<36x4xf32> to vector<4x4xf32>
    %74 = vector.extract_strided_slice %68 {offsets = [0, 128], sizes = [4, 128], strides = [1, 1]} : vector<4x1152xf32> to vector<4x128xf32>
    %cst_33 = arith.constant dense<0.000000e+00> : vector<4x128xf32>
    %75 = tpu.matmul %73, %74, %cst_33 {dimension_numbers = #tpu.dot_dimension_numbers<[1], [0], [0], [1], [0, 0, 1, 1], [], []>} : vector<4x4xf32>, vector<4x128xf32>, vector<4x128xf32> -> vector<4x128xf32>
    %76 = arith.addf %72, %75 : vector<4x128xf32>
    %77 = vector.extract_strided_slice %69 {offsets = [8, 0], sizes = [4, 4], strides = [1, 1]} : vector<36x4xf32> to vector<4x4xf32>
    %78 = vector.extract_strided_slice %68 {offsets = [0, 256], sizes = [4, 128], strides = [1, 1]} : vector<4x1152xf32> to vector<4x128xf32>
    %cst_34 = arith.constant dense<0.000000e+00> : vector<4x128xf32>
    %79 = tpu.matmul %77, %78, %cst_34 {dimension_numbers = #tpu.dot_dimension_numbers<[1], [0], [0], [1], [0, 0, 1, 1], [], []>} : vector<4x4xf32>, vector<4x128xf32>, vector<4x128xf32> -> vector<4x128xf32>
    %80 = arith.addf %76, %79 : vector<4x128xf32>
    %81 = vector.extract_strided_slice %69 {offsets = [12, 0], sizes = [4, 4], strides = [1, 1]} : vector<36x4xf32> to vector<4x4xf32>
    %82 = vector.extract_strided_slice %68 {offsets = [0, 384], sizes = [4, 128], strides = [1, 1]} : vector<4x1152xf32> to vector<4x128xf32>
    %cst_35 = arith.constant dense<0.000000e+00> : vector<4x128xf32>
    %83 = tpu.matmul %81, %82, %cst_35 {dimension_numbers = #tpu.dot_dimension_numbers<[1], [0], [0], [1], [0, 0, 1, 1], [], []>} : vector<4x4xf32>, vector<4x128xf32>, vector<4x128xf32> -> vector<4x128xf32>
    %84 = arith.addf %80, %83 : vector<4x128xf32>
    %85 = vector.extract_strided_slice %69 {offsets = [16, 0], sizes = [4, 4], strides = [1, 1]} : vector<36x4xf32> to vector<4x4xf32>
    %86 = vector.extract_strided_slice %68 {offsets = [0, 512], sizes = [4, 128], strides = [1, 1]} : vector<4x1152xf32> to vector<4x128xf32>
    %cst_36 = arith.constant dense<0.000000e+00> : vector<4x128xf32>
    %87 = tpu.matmul %85, %86, %cst_36 {dimension_numbers = #tpu.dot_dimension_numbers<[1], [0], [0], [1], [0, 0, 1, 1], [], []>} : vector<4x4xf32>, vector<4x128xf32>, vector<4x128xf32> -> vector<4x128xf32>
    %88 = arith.addf %84, %87 : vector<4x128xf32>
    %89 = vector.extract_strided_slice %69 {offsets = [20, 0], sizes = [4, 4], strides = [1, 1]} : vector<36x4xf32> to vector<4x4xf32>
    %90 = vector.extract_strided_slice %68 {offsets = [0, 640], sizes = [4, 128], strides = [1, 1]} : vector<4x1152xf32> to vector<4x128xf32>
    %cst_37 = arith.constant dense<0.000000e+00> : vector<4x128xf32>
    %91 = tpu.matmul %89, %90, %cst_37 {dimension_numbers = #tpu.dot_dimension_numbers<[1], [0], [0], [1], [0, 0, 1, 1], [], []>} : vector<4x4xf32>, vector<4x128xf32>, vector<4x128xf32> -> vector<4x128xf32>
    %92 = arith.addf %88, %91 : vector<4x128xf32>
    %93 = vector.extract_strided_slice %69 {offsets = [24, 0], sizes = [4, 4], strides = [1, 1]} : vector<36x4xf32> to vector<4x4xf32>
    %94 = vector.extract_strided_slice %68 {offsets = [0, 768], sizes = [4, 128], strides = [1, 1]} : vector<4x1152xf32> to vector<4x128xf32>
    %cst_38 = arith.constant dense<0.000000e+00> : vector<4x128xf32>
    %95 = tpu.matmul %93, %94, %cst_38 {dimension_numbers = #tpu.dot_dimension_numbers<[1], [0], [0], [1], [0, 0, 1, 1], [], []>} : vector<4x4xf32>, vector<4x128xf32>, vector<4x128xf32> -> vector<4x128xf32>
    %96 = arith.addf %92, %95 : vector<4x128xf32>
    %97 = vector.extract_strided_slice %69 {offsets = [28, 0], sizes = [4, 4], strides = [1, 1]} : vector<36x4xf32> to vector<4x4xf32>
    %98 = vector.extract_strided_slice %68 {offsets = [0, 896], sizes = [4, 128], strides = [1, 1]} : vector<4x1152xf32> to vector<4x128xf32>
    %cst_39 = arith.constant dense<0.000000e+00> : vector<4x128xf32>
    %99 = tpu.matmul %97, %98, %cst_39 {dimension_numbers = #tpu.dot_dimension_numbers<[1], [0], [0], [1], [0, 0, 1, 1], [], []>} : vector<4x4xf32>, vector<4x128xf32>, vector<4x128xf32> -> vector<4x128xf32>
    %100 = arith.addf %96, %99 : vector<4x128xf32>
    %101 = vector.extract_strided_slice %69 {offsets = [32, 0], sizes = [4, 4], strides = [1, 1]} : vector<36x4xf32> to vector<4x4xf32>
    %102 = vector.extract_strided_slice %68 {offsets = [0, 1024], sizes = [4, 128], strides = [1, 1]} : vector<4x1152xf32> to vector<4x128xf32>
    %cst_40 = arith.constant dense<0.000000e+00> : vector<4x128xf32>
    %103 = tpu.matmul %101, %102, %cst_40 {dimension_numbers = #tpu.dot_dimension_numbers<[1], [0], [0], [1], [0, 0, 1, 1], [], []>} : vector<4x4xf32>, vector<4x128xf32>, vector<4x128xf32> -> vector<4x128xf32>
    %104 = arith.addf %100, %103 : vector<4x128xf32>
    %c0_41 = arith.constant 0 : index
    %c0_42 = arith.constant 0 : index
    %105 = vector.load %arg8[%c0_41, %c0_42] : memref<4x3xf32, #tpu.memory_space<vmem>>, vector<4x1xf32>
    %106 = vector.broadcast %105 : vector<4x1xf32> to vector<4x128xf32>
    %107 = arith.addf %104, %106 : vector<4x128xf32>
    %cst_43 = arith.constant dense<0.000000e+00> : vector<4xf32>
    %108 = vector.multi_reduction <add>, %107, %cst_43 [1] : vector<4x128xf32> to vector<4xf32>
    %109 = vector.shape_cast %108 : vector<4xf32> to vector<4x1xf32>
    %cst_44 = arith.constant 1.280000e+02 : f32
    %110 = vector.broadcast %cst_44 : f32 to vector<4x1xf32>
    %111 = arith.divf %109, %110 : vector<4x1xf32>
    %112 = vector.broadcast %111 : vector<4x1xf32> to vector<4x128xf32>
    %113 = arith.subf %107, %112 : vector<4x128xf32>
    %114 = arith.mulf %113, %113 : vector<4x128xf32>
    %cst_45 = arith.constant dense<0.000000e+00> : vector<4xf32>
    %115 = vector.multi_reduction <add>, %114, %cst_45 [1] : vector<4x128xf32> to vector<4xf32>
    %116 = vector.shape_cast %115 : vector<4xf32> to vector<4x1xf32>
    %cst_46 = arith.constant 1.280000e+02 : f32
    %117 = vector.broadcast %cst_46 : f32 to vector<4x1xf32>
    %118 = arith.divf %116, %117 : vector<4x1xf32>
    %c0_47 = arith.constant 0 : index
    %c1_48 = arith.constant 1 : index
    %119 = vector.load %arg8[%c0_47, %c1_48] : memref<4x3xf32, #tpu.memory_space<vmem>>, vector<4x1xf32>
    %cst_49 = arith.constant 9.99999974E-6 : f32
    %120 = vector.broadcast %cst_49 : f32 to vector<4x1xf32>
    %121 = arith.addf %118, %120 : vector<4x1xf32>
    %122 = math.rsqrt %121 : vector<4x1xf32>
    %123 = arith.mulf %119, %122 : vector<4x1xf32>
    %124 = vector.broadcast %123 : vector<4x1xf32> to vector<4x128xf32>
    %125 = arith.mulf %113, %124 : vector<4x128xf32>
    %c0_50 = arith.constant 0 : index
    %c2_51 = arith.constant 2 : index
    %126 = vector.load %arg8[%c0_50, %c2_51] : memref<4x3xf32, #tpu.memory_space<vmem>>, vector<4x1xf32>
    %127 = vector.broadcast %126 : vector<4x1xf32> to vector<4x128xf32>
    %128 = arith.addf %125, %127 : vector<4x128xf32>
    %cst_52 = arith.constant 0.000000e+00 : f32
    %129 = vector.broadcast %cst_52 : f32 to vector<4x128xf32>
    %130 = arith.maximumf %128, %129 : vector<4x128xf32>
    %c0_53 = arith.constant 0 : index
    %c0_54 = arith.constant 0 : index
    %131 = vector.load %arg1[%c0_53, %c0_54] : memref<4x16xf32, #tpu.memory_space<vmem>>, vector<4x16xf32>
    %c0_55 = arith.constant 0 : index
    %c0_56 = arith.constant 0 : index
    %132 = vector.load %arg4[%c0_55, %c0_56] : memref<16x128xf32, #tpu.memory_space<vmem>>, vector<16x128xf32>
    %cst_57 = arith.constant dense<0.000000e+00> : vector<4x128xf32>
    %133 = tpu.matmul %131, %132, %cst_57 {dimension_numbers = #tpu.dot_dimension_numbers<[1], [0], [0], [1], [0, 0, 1, 1], [], []>} : vector<4x16xf32>, vector<16x128xf32>, vector<4x128xf32> -> vector<4x128xf32>
    %134 = arith.addf %130, %133 : vector<4x128xf32>
    %c0_58 = arith.constant 0 : index
    %c0_59 = arith.constant 0 : index
    %135 = vector.load %arg3[%c0_58, %c0_59] : memref<128x1152xf32, #tpu.memory_space<vmem>>, vector<128x1152xf32>
    %cst_60 = arith.constant dense<0.000000e+00> : vector<4x1152xf32>
    %136 = tpu.matmul %134, %135, %cst_60 {dimension_numbers = #tpu.dot_dimension_numbers<[1], [0], [0], [1], [0, 0, 1, 1], [], []>} : vector<4x128xf32>, vector<128x1152xf32>, vector<4x1152xf32> -> vector<4x1152xf32>
    %c0_61 = arith.constant 0 : index
    %c0_62 = arith.constant 0 : index
    %137 = vector.load %arg9[%c0_61, %c0_62] : memref<36x4xf32, #tpu.memory_space<vmem>>, vector<36x4xf32>
    %138 = vector.extract_strided_slice %137 {offsets = [0, 0], sizes = [4, 4], strides = [1, 1]} : vector<36x4xf32> to vector<4x4xf32>
    %139 = vector.extract_strided_slice %136 {offsets = [0, 0], sizes = [4, 128], strides = [1, 1]} : vector<4x1152xf32> to vector<4x128xf32>
    %cst_63 = arith.constant dense<0.000000e+00> : vector<4x128xf32>
    %140 = tpu.matmul %138, %139, %cst_63 {dimension_numbers = #tpu.dot_dimension_numbers<[1], [0], [0], [1], [0, 0, 1, 1], [], []>} : vector<4x4xf32>, vector<4x128xf32>, vector<4x128xf32> -> vector<4x128xf32>
    %141 = vector.extract_strided_slice %137 {offsets = [4, 0], sizes = [4, 4], strides = [1, 1]} : vector<36x4xf32> to vector<4x4xf32>
    %142 = vector.extract_strided_slice %136 {offsets = [0, 128], sizes = [4, 128], strides = [1, 1]} : vector<4x1152xf32> to vector<4x128xf32>
    %cst_64 = arith.constant dense<0.000000e+00> : vector<4x128xf32>
    %143 = tpu.matmul %141, %142, %cst_64 {dimension_numbers = #tpu.dot_dimension_numbers<[1], [0], [0], [1], [0, 0, 1, 1], [], []>} : vector<4x4xf32>, vector<4x128xf32>, vector<4x128xf32> -> vector<4x128xf32>
    %144 = arith.addf %140, %143 : vector<4x128xf32>
    %145 = vector.extract_strided_slice %137 {offsets = [8, 0], sizes = [4, 4], strides = [1, 1]} : vector<36x4xf32> to vector<4x4xf32>
    %146 = vector.extract_strided_slice %136 {offsets = [0, 256], sizes = [4, 128], strides = [1, 1]} : vector<4x1152xf32> to vector<4x128xf32>
    %cst_65 = arith.constant dense<0.000000e+00> : vector<4x128xf32>
    %147 = tpu.matmul %145, %146, %cst_65 {dimension_numbers = #tpu.dot_dimension_numbers<[1], [0], [0], [1], [0, 0, 1, 1], [], []>} : vector<4x4xf32>, vector<4x128xf32>, vector<4x128xf32> -> vector<4x128xf32>
    %148 = arith.addf %144, %147 : vector<4x128xf32>
    %149 = vector.extract_strided_slice %137 {offsets = [12, 0], sizes = [4, 4], strides = [1, 1]} : vector<36x4xf32> to vector<4x4xf32>
    %150 = vector.extract_strided_slice %136 {offsets = [0, 384], sizes = [4, 128], strides = [1, 1]} : vector<4x1152xf32> to vector<4x128xf32>
    %cst_66 = arith.constant dense<0.000000e+00> : vector<4x128xf32>
    %151 = tpu.matmul %149, %150, %cst_66 {dimension_numbers = #tpu.dot_dimension_numbers<[1], [0], [0], [1], [0, 0, 1, 1], [], []>} : vector<4x4xf32>, vector<4x128xf32>, vector<4x128xf32> -> vector<4x128xf32>
    %152 = arith.addf %148, %151 : vector<4x128xf32>
    %153 = vector.extract_strided_slice %137 {offsets = [16, 0], sizes = [4, 4], strides = [1, 1]} : vector<36x4xf32> to vector<4x4xf32>
    %154 = vector.extract_strided_slice %136 {offsets = [0, 512], sizes = [4, 128], strides = [1, 1]} : vector<4x1152xf32> to vector<4x128xf32>
    %cst_67 = arith.constant dense<0.000000e+00> : vector<4x128xf32>
    %155 = tpu.matmul %153, %154, %cst_67 {dimension_numbers = #tpu.dot_dimension_numbers<[1], [0], [0], [1], [0, 0, 1, 1], [], []>} : vector<4x4xf32>, vector<4x128xf32>, vector<4x128xf32> -> vector<4x128xf32>
    %156 = arith.addf %152, %155 : vector<4x128xf32>
    %157 = vector.extract_strided_slice %137 {offsets = [20, 0], sizes = [4, 4], strides = [1, 1]} : vector<36x4xf32> to vector<4x4xf32>
    %158 = vector.extract_strided_slice %136 {offsets = [0, 640], sizes = [4, 128], strides = [1, 1]} : vector<4x1152xf32> to vector<4x128xf32>
    %cst_68 = arith.constant dense<0.000000e+00> : vector<4x128xf32>
    %159 = tpu.matmul %157, %158, %cst_68 {dimension_numbers = #tpu.dot_dimension_numbers<[1], [0], [0], [1], [0, 0, 1, 1], [], []>} : vector<4x4xf32>, vector<4x128xf32>, vector<4x128xf32> -> vector<4x128xf32>
    %160 = arith.addf %156, %159 : vector<4x128xf32>
    %161 = vector.extract_strided_slice %137 {offsets = [24, 0], sizes = [4, 4], strides = [1, 1]} : vector<36x4xf32> to vector<4x4xf32>
    %162 = vector.extract_strided_slice %136 {offsets = [0, 768], sizes = [4, 128], strides = [1, 1]} : vector<4x1152xf32> to vector<4x128xf32>
    %cst_69 = arith.constant dense<0.000000e+00> : vector<4x128xf32>
    %163 = tpu.matmul %161, %162, %cst_69 {dimension_numbers = #tpu.dot_dimension_numbers<[1], [0], [0], [1], [0, 0, 1, 1], [], []>} : vector<4x4xf32>, vector<4x128xf32>, vector<4x128xf32> -> vector<4x128xf32>
    %164 = arith.addf %160, %163 : vector<4x128xf32>
    %165 = vector.extract_strided_slice %137 {offsets = [28, 0], sizes = [4, 4], strides = [1, 1]} : vector<36x4xf32> to vector<4x4xf32>
    %166 = vector.extract_strided_slice %136 {offsets = [0, 896], sizes = [4, 128], strides = [1, 1]} : vector<4x1152xf32> to vector<4x128xf32>
    %cst_70 = arith.constant dense<0.000000e+00> : vector<4x128xf32>
    %167 = tpu.matmul %165, %166, %cst_70 {dimension_numbers = #tpu.dot_dimension_numbers<[1], [0], [0], [1], [0, 0, 1, 1], [], []>} : vector<4x4xf32>, vector<4x128xf32>, vector<4x128xf32> -> vector<4x128xf32>
    %168 = arith.addf %164, %167 : vector<4x128xf32>
    %169 = vector.extract_strided_slice %137 {offsets = [32, 0], sizes = [4, 4], strides = [1, 1]} : vector<36x4xf32> to vector<4x4xf32>
    %170 = vector.extract_strided_slice %136 {offsets = [0, 1024], sizes = [4, 128], strides = [1, 1]} : vector<4x1152xf32> to vector<4x128xf32>
    %cst_71 = arith.constant dense<0.000000e+00> : vector<4x128xf32>
    %171 = tpu.matmul %169, %170, %cst_71 {dimension_numbers = #tpu.dot_dimension_numbers<[1], [0], [0], [1], [0, 0, 1, 1], [], []>} : vector<4x4xf32>, vector<4x128xf32>, vector<4x128xf32> -> vector<4x128xf32>
    %172 = arith.addf %168, %171 : vector<4x128xf32>
    %c0_72 = arith.constant 0 : index
    %c0_73 = arith.constant 0 : index
    %173 = vector.load %arg10[%c0_72, %c0_73] : memref<4x3xf32, #tpu.memory_space<vmem>>, vector<4x1xf32>
    %174 = vector.broadcast %173 : vector<4x1xf32> to vector<4x128xf32>
    %175 = arith.addf %172, %174 : vector<4x128xf32>
    %cst_74 = arith.constant dense<0.000000e+00> : vector<4xf32>
    %176 = vector.multi_reduction <add>, %175, %cst_74 [1] : vector<4x128xf32> to vector<4xf32>
    %177 = vector.shape_cast %176 : vector<4xf32> to vector<4x1xf32>
    %cst_75 = arith.constant 1.280000e+02 : f32
    %178 = vector.broadcast %cst_75 : f32 to vector<4x1xf32>
    %179 = arith.divf %177, %178 : vector<4x1xf32>
    %180 = vector.broadcast %179 : vector<4x1xf32> to vector<4x128xf32>
    %181 = arith.subf %175, %180 : vector<4x128xf32>
    %182 = arith.mulf %181, %181 : vector<4x128xf32>
    %cst_76 = arith.constant dense<0.000000e+00> : vector<4xf32>
    %183 = vector.multi_reduction <add>, %182, %cst_76 [1] : vector<4x128xf32> to vector<4xf32>
    %184 = vector.shape_cast %183 : vector<4xf32> to vector<4x1xf32>
    %cst_77 = arith.constant 1.280000e+02 : f32
    %185 = vector.broadcast %cst_77 : f32 to vector<4x1xf32>
    %186 = arith.divf %184, %185 : vector<4x1xf32>
    %c0_78 = arith.constant 0 : index
    %c1_79 = arith.constant 1 : index
    %187 = vector.load %arg10[%c0_78, %c1_79] : memref<4x3xf32, #tpu.memory_space<vmem>>, vector<4x1xf32>
    %cst_80 = arith.constant 9.99999974E-6 : f32
    %188 = vector.broadcast %cst_80 : f32 to vector<4x1xf32>
    %189 = arith.addf %186, %188 : vector<4x1xf32>
    %190 = math.rsqrt %189 : vector<4x1xf32>
    %191 = arith.mulf %187, %190 : vector<4x1xf32>
    %192 = vector.broadcast %191 : vector<4x1xf32> to vector<4x128xf32>
    %193 = arith.mulf %181, %192 : vector<4x128xf32>
    %c0_81 = arith.constant 0 : index
    %c2_82 = arith.constant 2 : index
    %194 = vector.load %arg10[%c0_81, %c2_82] : memref<4x3xf32, #tpu.memory_space<vmem>>, vector<4x1xf32>
    %195 = vector.broadcast %194 : vector<4x1xf32> to vector<4x128xf32>
    %196 = arith.addf %193, %195 : vector<4x128xf32>
    %cst_83 = arith.constant 0.000000e+00 : f32
    %197 = vector.broadcast %cst_83 : f32 to vector<4x128xf32>
    %198 = arith.maximumf %196, %197 : vector<4x128xf32>
    %c0_84 = arith.constant 0 : index
    %c0_85 = arith.constant 0 : index
    %199 = vector.load %arg11[%c0_84, %c0_85] : memref<3x4xf32, #tpu.memory_space<vmem>>, vector<3x4xf32>
    %cst_86 = arith.constant dense<0.000000e+00> : vector<3x128xf32>
    %200 = tpu.matmul %199, %198, %cst_86 {dimension_numbers = #tpu.dot_dimension_numbers<[1], [0], [0], [1], [0, 0, 1, 1], [], []>} : vector<3x4xf32>, vector<4x128xf32>, vector<3x128xf32> -> vector<3x128xf32>
    %c0_87 = arith.constant 0 : index
    %c0_88 = arith.constant 0 : index
    %201 = vector.load %arg12[%c0_87, %c0_88] : memref<3x1xf32, #tpu.memory_space<vmem>>, vector<3x1xf32>
    %202 = vector.broadcast %201 : vector<3x1xf32> to vector<3x128xf32>
    %203 = arith.addf %200, %202 : vector<3x128xf32>
    %c128 = arith.constant 128 : index
    %c0_89 = arith.constant 0 : index
    %204 = vector.load %arg2[%c128, %c0_89] : memref<256x128xf32, #tpu.memory_space<vmem>>, vector<128x128xf32>
    %cst_90 = arith.constant dense<0.000000e+00> : vector<3x128xf32>
    %205 = tpu.matmul %203, %204, %cst_90 {dimension_numbers = #tpu.dot_dimension_numbers<[1], [0], [0], [1], [0, 0, 1, 1], [], []>} : vector<3x128xf32>, vector<128x128xf32>, vector<3x128xf32> -> vector<3x128xf32>
    %c0_91 = arith.constant 0 : index
    %c0_92 = arith.constant 0 : index
    %206 = vector.load %arg13[%c0_91, %c0_92] : memref<3x128xf32, #tpu.memory_space<vmem>>, vector<3x128xf32>
    tpu.vector_store %arg13[%c0_91, %c0_92], %205 {strides = array<i32>} : memref<3x128xf32, #tpu.memory_space<vmem>>, vector<3x128xf32>,
    return
  }
}

</mosaic_0001>

<bundles_post_ra>
// kernel: encoder_forward.1
= control target key start
LH: loop header
LB: loop body
LE: loop exit
PB: predicated region body
PF: predicated region fallthrough
CT: control target
= control target key end

     0   :  { %v6469_v0 = vmov 0.0   ;;  %vm4466_vm0 = vmmov 0   ;;  %vm639_vm1 = vcmask 1042432   ;;  %vm636_vm2 = vcmask 23552   ;;  %s6455_s2 = inlined_call_operand.vmem [shape: f32[256,128], index: 2, kind: input, shape index: {}]   ;;  %s6456_s3 = inlined_call_operand.vmem [shape: f32[128,1152], index: 3, kind: input, shape index: {}]   ;;  %s6457_s0 = inlined_call_operand.vmem [shape: f32[3,128], index: 0, kind: input, shape index: {}]   ;;  %s6458_s6 = inlined_call_operand.vmem [shape: f32[4,3], index: 6, kind: input, shape index: {}]   ;;  %s6459_s5 = inlined_call_operand.vmem [shape: f32[36,3], index: 5, kind: input, shape index: {}]   ;;  %s6460_s8 = inlined_call_operand.vmem [shape: f32[4,3], index: 8, kind: input, shape index: {}]   ;;  %s6461_s7 = inlined_call_operand.vmem [shape: f32[36,4], index: 7, kind: input, shape index: {}]   ;;  %s6462_s4 = inlined_call_operand.vmem [shape: f32[16,128], index: 4, kind: input, shape index: {}]   ;;  %s6463_s1 = inlined_call_operand.vmem [shape: f32[4,16], index: 1, kind: input, shape index: {}]   ;;  %s6464_s10 = inlined_call_operand.vmem [shape: f32[4,3], index: 10, kind: input, shape index: {}]   ;;  %s6465_s9 = inlined_call_operand.vmem [shape: f32[36,4], index: 9, kind: input, shape index: {}]   ;;  %s6466_s12 = inlined_call_operand.vmem [shape: f32[3,1], index: 12, kind: input, shape index: {}]   ;;  %s6467_s11 = inlined_call_operand.vmem [shape: f32[3,4], index: 11, kind: input, shape index: {}]   ;;  %s6468_s13 = inlined_call_operand.vmem [shape: f32[3,128], index: 13, kind: output, shape index: {}]  }
   0x1   :  { %3979 = vmatprep.subr.mxu0 %v6469_v0  ;;  %v60_v1 = vld [vmem:[%s6455_s2 + $0x78] sm:$0xff]  ;;  %v59_v2 = vld [vmem:[%s6455_s2 + $0x70] sm:$0xff]  ;;  %4011 = vmatprep.mubr.msk.f32.mxu0 %vm4466_vm0, %v6469_v0  ;;  %v58_v3 = vld [vmem:[%s6455_s2 + $0x68] sm:$0xff]  ;;  %vm1334_vm3 = vcmask 1043456   ;;  %vm1722_vm4 = vcmask 31744   ;;  %vm2447_vm5 = vcmask 130048  }
   0x2   :  { %3980 = vmatpush3.msra.mxu0 %v60_v1  ;;  %339 = vmatprep.mubr.f32.mxu1 %v6469_v0  ;;  %v57_v4 = vld [vmem:[%s6455_s2 + $0x60] sm:$0xff]  ;;  %v56_v6 = vld [vmem:[%s6455_s2 + $0x58] sm:$0xff]  ;;  %v4582_v9 = vld [vmem:[%s6456_s3 + $0x3f0] sm:$0xff] }
   0x3   :  { %3981 = vmatprep.subr.mxu0 %v6469_v0  ;;  %v4561_v5 = vld [vmem:[%s6456_s3 + $0x440] sm:$0xff]  ;;  %v4571_v7 = vld [vmem:[%s6456_s3 + $0x438] sm:$0xff]  ;;  %v55_v10 = vld [vmem:[%s6455_s2 + $0x50] sm:$0xff] }
   0x4   :  { %3982 = vmatpush3.msra.mxu0 %v59_v2  ;;  %275 = vmatprep.subr.mxu1 %v4561_v5  ;;  %v4577_v8 = vld [vmem:[%s6456_s3 + $0x3f8] sm:$0xff]  ;;  %v4592_v11 = vld [vmem:[%s6456_s3 + $0x3b0] sm:$0xff]  ;;  %v4598_v12 = vld [vmem:[%s6456_s3 + $0x3a8] sm:$0xff] }
   0x5   :  { %3983 = vmatprep.subr.mxu0 %v6469_v0  ;;  %276 = vmatpush1.msra.mxu1 %v4571_v7  ;;  %v4603_v13 = vld [vmem:[%s6456_s3 + $0x368] sm:$0xff]  ;;  %v4613_v15 = vld [vmem:[%s6456_s3 + $0x360] sm:$0xff]  ;;  %v4629_v18 = vld [vmem:[%s6456_s3 + $0x318] sm:$0xff] }
   0x6   :  { %3984 = vmatpush3.msra.mxu0 %v58_v3  ;;  %277 = vmatprep.subr.mxu1 %v4577_v8  ;;  %v54_v14 = vld [vmem:[%s6455_s2 + $0x48] sm:$0xff]  ;;  %v4619_v16 = vld [vmem:[%s6456_s3 + $0x320] sm:$0xff]  ;;  %v4635_v19 = vld [vmem:[%s6456_s3 + $0x2d8] sm:$0xff] }
   0x7   :  { %3985 = vmatprep.subr.mxu0 %v6469_v0  ;;  %278 = vmatpush1.msra.mxu1 %v4582_v9  ;;  %v53_v17 = vld [vmem:[%s6455_s2 + $0x40] sm:$0xff]  ;;  %v52_v20 = vld [vmem:[%s6455_s2 + $0x38] sm:$0xff]  ;;  %v4645_v21 = vld [vmem:[%s6456_s3 + $0x2d0] sm:$0xff] }
   0x8   :  { %3986 = vmatpush3.msra.mxu0 %v57_v4  ;;  %279 = vmatprep.subr.mxu1 %v4592_v11  ;;  %v4651_v22 = vld [vmem:[%s6456_s3 + $0x290] sm:$0xff]  ;;  %v4661_v24 = vld [vmem:[%s6456_s3 + $0x288] sm:$0xff]  ;;  %v4677_v27 = vld [vmem:[%s6456_s3 + $0x240] sm:$0xff] }
   0x9   :  { %3987 = vmatprep.subr.mxu0 %v6469_v0  ;;  %280 = vmatpush1.msra.mxu1 %v4598_v12  ;;  %v51_v23 = vld [vmem:[%s6455_s2 + $0x30] sm:$0xff]  ;;  %v4667_v25 = vld [vmem:[%s6456_s3 + $0x248] sm:$0xff]  ;;  %v4683_v28 = vld [vmem:[%s6456_s3 + $0x200] sm:$0xff] }
   0xa   :  { %3988 = vmatpush3.msra.mxu0 %v56_v6  ;;  %281 = vmatprep.subr.mxu1 %v4603_v13  ;;  %v50_v26 = vld [vmem:[%s6455_s2 + $0x28] sm:$0xff]  ;;  %v49_v29 = vld [vmem:[%s6455_s2 + $0x20] sm:$0xff]  ;;  %v4693_v30 = vld [vmem:[%s6456_s3 + $0x1f8] sm:$0xff] }
   0xb   :  { %3989 = vmatprep.subr.mxu0 %v6469_v0  ;;  %282 = vmatpush1.msra.mxu1 %v4613_v15  ;;  %v4699_v31 = vld [vmem:[%s6456_s3 + $0x1b8] sm:$0xff]  ;;  %v4709_v33 = vld [vmem:[%s6456_s3 + $0x1b0] sm:$0xff]  ;;  %v4725_v36 = vld [vmem:[%s6456_s3 + $0x168] sm:$0xff] }
   0xc   :  { %3990 = vmatpush3.msra.mxu0 %v55_v10  ;;  %283 = vmatprep.subr.mxu1 %v4619_v16  ;;  %v48_v32 = vld [vmem:[%s6455_s2 + $0x18] sm:$0xff]  ;;  %v4715_v34 = vld [vmem:[%s6456_s3 + $0x170] sm:$0xff]  ;;  %v4731_v37 = vld [vmem:[%s6456_s3 + $0x128] sm:$0xff] }
   0xd   :  { %3991 = vmatprep.subr.mxu0 %v6469_v0  ;;  %284 = vmatpush1.msra.mxu1 %v4629_v18  ;;  %v47_v35 = vld [vmem:[%s6455_s2 + $0x10] sm:$0xff]  ;;  %v46_v38 = vld [vmem:[%s6455_s2 + $0x8] sm:$0xff]  ;;  %v4741_v39 = vld [vmem:[%s6456_s3 + $0x120] sm:$0xff] }
   0xe   :  { %3992 = vmatpush3.msra.mxu0 %v54_v14  ;;  %285 = vmatprep.subr.mxu1 %v4635_v19  ;;  %v4747_v40 = vld [vmem:[%s6456_s3 + $0xe0] sm:$0xff]  ;;  %v4757_v42 = vld [vmem:[%s6456_s3 + $0xd8] sm:$0xff]  ;;  %v4765_v44 = vld [vmem:[%s6456_s3 + $0x450] sm:$0xff] }
   0xf   :  { %3993 = vmatprep.subr.mxu0 %v6469_v0  ;;  %286 = vmatpush1.msra.mxu1 %v4645_v21  ;;  %v45_v41 = vld [vmem:[%s6455_s2] sm:$0xff]  ;;  %v4772_v45 = vld [vmem:[%s6456_s3 + $0x448] sm:$0xff]  ;;  %v4778_v46 = vld [vmem:[%s6456_s3 + $0x98] sm:$0xff] }
  0x10   :  { %3994 = vmatpush3.msra.mxu0 %v53_v17  ;;  %287 = vmatprep.subr.mxu1 %v4651_v22  ;;  %v44_v43 = vld [vmem:[%s6457_s0] sm:$0x7]  ;;  %v4783_v47 = vld [vmem:[%s6456_s3 + $0x408] sm:$0xff]  ;;  %v4789_v48 = vld [vmem:[%s6456_s3 + $0x90] sm:$0xff] }
  0x11   :  { %3995 = vmatprep.subr.mxu0 %v6469_v0  ;;  %288 = vmatpush1.msra.mxu1 %v4661_v24  ;;  %v4795_v49 = vld [vmem:[%s6456_s3 + $0x400] sm:$0xff]  ;;  %v4800_v50 = vld [vmem:[%s6456_s3 + $0x50] sm:$0xff]  ;;  %v4812_v52 = vld [vmem:[%s6456_s3 + $0x48] sm:$0xff] }
  0x12   :  { %3996 = vmatpush3.msra.mxu0 %v52_v20  ;;  %289 = vmatprep.subr.mxu1 %v4667_v25  ;;  %v4806_v51 = vld [vmem:[%s6456_s3 + $0x3c0] sm:$0xff]  ;;  %v4818_v53 = vld [vmem:[%s6456_s3 + $0x3b8] sm:$0xff]  ;;  %v4824_v54 = vld [vmem:[%s6456_s3 + $0x8] sm:$0xff] }
  0x13   :  { %3997 = vmatprep.subr.mxu0 %v6469_v0  ;;  %290 = vmatpush1.msra.mxu1 %v4677_v27  ;;  %v4830_v55 = vld [vmem:[%s6456_s3 + $0x378] sm:$0xff]  ;;  %v4836_v56 = vld [vmem:[%s6456_s3] sm:$0xff]  ;;  %v4842_v57 = vld [vmem:[%s6456_s3 + $0x370] sm:$0xff] }
  0x14   :  { %3998 = vmatpush3.msra.mxu0 %v51_v23  ;;  %291 = vmatprep.subr.mxu1 %v4683_v28  ;;  %v4849_v58 = vld [vmem:[%s6456_s3 + $0x330] sm:$0xff]  ;;  %v4856_v59 = vld [vmem:[%s6456_s3 + $0x328] sm:$0xff]  ;;  %v4870_v61 = vld [vmem:[%s6456_s3 + $0x2e0] sm:$0xff] }
  0x15   :  { %3999 = vmatprep.subr.mxu0 %v6469_v0  ;;  %292 = vmatpush1.msra.mxu1 %v4693_v30  ;;  %v4863_v60 = vld [vmem:[%s6456_s3 + $0x2e8] sm:$0xff]  ;;  %v4876_v62 = vld [vmem:[%s6456_s3 + $0x2a0] sm:$0xff]  ;;  %v4882_v63 = vld [vmem:[%s6456_s3 + $0x298] sm:$0xff] }
  0x16   :  { %4000 = vmatpush3.msra.mxu0 %v50_v26  ;;  %293 = vmatprep.subr.mxu1 %v4699_v31  ;;  %v4888_v1 = vld [vmem:[%s6456_s3 + $0x258] sm:$0xff]  ;;  %v4894_v2 = vld [vmem:[%s6456_s3 + $0x250] sm:$0xff]  ;;  %v4906_v4 = vld [vmem:[%s6456_s3 + $0x208] sm:$0xff] }
  0x17   :  { %4001 = vmatprep.subr.mxu0 %v6469_v0  ;;  %294 = vmatpush1.msra.mxu1 %v4709_v33  ;;  %v4900_v3 = vld [vmem:[%s6456_s3 + $0x210] sm:$0xff]  ;;  %v4912_v6 = vld [vmem:[%s6456_s3 + $0x1c8] sm:$0xff]  ;;  %v4918_v10 = vld [vmem:[%s6456_s3 + $0x1c0] sm:$0xff] }
  0x18   :  { %4002 = vmatpush3.msra.mxu0 %v49_v29  ;;  %295 = vmatprep.subr.mxu1 %v4715_v34  ;;  %v4924_v14 = vld [vmem:[%s6456_s3 + $0x180] sm:$0xff]  ;;  %v4930_v17 = vld [vmem:[%s6456_s3 + $0x178] sm:$0xff]  ;;  %v4942_v23 = vld [vmem:[%s6456_s3 + $0x130] sm:$0xff] }
  0x19   :  { %4003 = vmatprep.subr.mxu0 %v6469_v0  ;;  %296 = vmatpush1.msra.mxu1 %v4725_v36  ;;  %6563 = vst [vmem:[#allocation2_spill] sm:$0xff] %v4930_v17  ;;  %v4936_v20 = vld [vmem:[%s6456_s3 + $0x138] sm:$0xff]  ;;  %6565 = vst [vmem:[#allocation4_spill] sm:$0xff] %v4942_v23  ;;  %v4948_v26 = vld [vmem:[%s6456_s3 + $0xf0] sm:$0xff] }
  0x1a   :  { %4004 = vmatpush3.msra.mxu0 %v48_v32  ;;  %297 = vmatprep.subr.mxu1 %v4731_v37  ;;  %6564 = vst [vmem:[#allocation3_spill] sm:$0xff] %v4936_v20  ;;  %6566 = vst [vmem:[#allocation5_spill] sm:$0xff] %v4948_v26  ;;  %v4954_v29 = vld [vmem:[%s6456_s3 + $0xe8] sm:$0xff] }
  0x1b   :  { %4005 = vmatprep.subr.mxu0 %v6469_v0  ;;  %298 = vmatpush1.msra.mxu1 %v4741_v39  ;;  %6567 = vst [vmem:[#allocation6_spill] sm:$0xff] %v4954_v29  ;;  %v4960_v32 = vld [vmem:[%s6456_s3 + $0xa8] sm:$0xff] }
  0x1c   :  { %4006 = vmatpush3.msra.mxu0 %v47_v35  ;;  %299 = vmatprep.subr.mxu1 %v4747_v40  ;;  %6568 = vst [vmem:[#allocation7_spill] sm:$0xff] %v4960_v32  ;;  %v4966_v35 = vld [vmem:[%s6456_s3 + $0xa0] sm:$0xff] }
  0x1d   :  { %4007 = vmatprep.subr.mxu0 %v6469_v0  ;;  %300 = vmatpush1.msra.mxu1 %v4757_v42  ;;  %6569 = vst [vmem:[#allocation8_spill] sm:$0xff] %v4966_v35 }
  0x1e   :  { %4008 = vmatpush3.msra.mxu0 %v46_v38  ;;  %301 = vmatprep.subr.mxu1 %v4778_v46  ;;  %v4972_v38 = vld [vmem:[%s6456_s3 + $0x60] sm:$0xff] }
  0x1f   :  { %4009 = vmatprep.subr.mxu0 %v6469_v0  ;;  %302 = vmatpush1.msra.mxu1 %v4789_v48  ;;  %6570 = vst [vmem:[#allocation9_spill] sm:$0xff] %v4972_v38 }
  0x20   :  { %4010 = vmatpush3.msra.mxu0 %v45_v41  ;;  %303 = vmatprep.subr.mxu1 %v4800_v50  ;;  %v4978_v41 = vld [vmem:[%s6456_s3 + $0x58] sm:$0xff] }
  0x21   :  { %4012 = vmatmul.mubr.f32.vlgmr.msra.gmra.mxu0 %v44_v43  ;;  %346 = vmatprep.subr.mxu0 %v4765_v44  ;;  %6571 = vst [vmem:[#allocation10_spill] sm:$0xff] %v4978_v41  ;;  %v4984_v43 = vld [vmem:[%s6456_s3 + $0x18] sm:$0xff] }
  0x22   :  { %347 = vmatpush1.msra.mxu0 %v4772_v45  ;;  %304 = vmatpush1.msra.mxu1 %v4812_v52  ;;  %6572 = vst [vmem:[#allocation11_spill] sm:$0xff] %v4984_v43 }
  0x23   :  { %348 = vmatprep.subr.mxu0 %v4783_v47  ;;  %305 = vmatprep.subr.mxu1 %v4824_v54 }
  0x24   :  { %349 = vmatpush1.msra.mxu0 %v4795_v49  ;;  %306 = vmatpush1.msra.mxu1 %v4836_v56 }
  0x25   :  { %350 = vmatprep.subr.mxu0 %v4806_v51  ;;  %410 = vmatprep.mubr.f32.mxu0 %v6469_v0  ;;  %v4990_v0 = vld [vmem:[%s6456_s3 + $0x10] sm:$0xff] }
  0x26   :  { %351 = vmatpush1.msra.mxu0 %v4818_v53  ;;  %6573 = vst [vmem:[#allocation12_spill] sm:$0xff] %v4990_v0 }
  0x27   :  { %352 = vmatprep.subr.mxu0 %v4830_v55 }
  0x28   :  { %353 = vmatpush1.msra.mxu0 %v4842_v57 }
  0x29   :  { %354 = vmatprep.subr.mxu0 %v4849_v58 }
  0x2a   :  { %355 = vmatpush1.msra.mxu0 %v4856_v59 }
  0x2b   :  { %356 = vmatprep.subr.mxu0 %v4863_v60 }
  0x2c   :  { %357 = vmatpush1.msra.mxu0 %v4870_v61 }
  0x2d   :  { %358 = vmatprep.subr.mxu0 %v4876_v62 }
  0x2e   :  { %359 = vmatpush1.msra.mxu0 %v4882_v63 }
  0x2f   :  { %360 = vmatprep.subr.mxu0 %v4888_v1 }
  0x30   :  { %361 = vmatpush1.msra.mxu0 %v4894_v2 }
  0x31   :  { %362 = vmatprep.subr.mxu0 %v4900_v3 }
  0x32   :  { %363 = vmatpush1.msra.mxu0 %v4906_v4 }
  0x33   :  { %364 = vmatprep.subr.mxu0 %v4912_v6 }
  0x34   :  { %365 = vmatpush1.msra.mxu0 %v4918_v10 }
  0x35   :  { %366 = vmatprep.subr.mxu0 %v4924_v14 }
  0x36   :  { %367 = vmatpush1.msra.mxu0 %v4930_v17  ;;  %v5051_v17 = vld [vmem:[%s6456_s3 + $0x3e0] sm:$0xff] }
  0x37   :  { %368 = vmatprep.subr.mxu0 %v4936_v20  ;;  %v5046_v20 = vld [vmem:[%s6456_s3 + $0x3d0] sm:$0xff]  ;;  %6582 = vst [vmem:[#allocation21_spill] sm:$0xff] %v5051_v17 }
  0x38   :  { %369 = vmatpush1.msra.mxu0 %v4942_v23  ;;  %6581 = vst [vmem:[#allocation20_spill] sm:$0xff] %v5046_v20 }
  0x39   :  { %370 = vmatprep.subr.mxu0 %v4948_v26  ;;  %v5039_v26 = vld [vmem:[%s6456_s3 + $0x420] sm:$0xff] }
  0x3a   :  { %371 = vmatpush1.msra.mxu0 %v4954_v29  ;;  %v5034_v29 = vld [vmem:[%s6456_s3 + $0x410] sm:$0xff]  ;;  %6580 = vst [vmem:[#allocation19_spill] sm:$0xff] %v5039_v26 }
  0x3b   :  { %372 = vmatprep.subr.mxu0 %v4960_v32  ;;  %v5022_v32 = vld [vmem:[%s6456_s3 + $0x418] sm:$0xff]  ;;  %6579 = vst [vmem:[#allocation18_spill] sm:$0xff] %v5034_v29 }
  0x3c   :  { %373 = vmatpush1.msra.mxu0 %v4966_v35  ;;  %v4998_v35 = vld [vmem:[%s6456_s3 + $0x460] sm:$0xff]  ;;  %6577 = vst [vmem:[#allocation16_spill] sm:$0xff] %v5022_v32 }
  0x3d   :  { %374 = vmatprep.subr.mxu0 %v4972_v38  ;;  %v5003_v38 = vld [vmem:[%s6456_s3 + $0x470] sm:$0xff]  ;;  %417 = vmatprep.subr.mxu1 %v4998_v35 }
  0x3e   :  { %375 = vmatpush1.msra.mxu0 %v4978_v41  ;;  %6574 = vst [vmem:[#allocation13_spill] sm:$0xff] %v5003_v38 }
  0x3f   :  { %376 = vmatprep.subr.mxu0 %v4984_v43  ;;  %v5010_v43 = vld [vmem:[%s6456_s3 + $0x458] sm:$0xff] }
  0x40   :  { %377 = vmatpush1.msra.mxu0 %v4990_v0  ;;  %6575 = vst [vmem:[#allocation14_spill] sm:$0xff] %v5010_v43  ;;  %v5015_v0 = vld [vmem:[%s6456_s3 + $0x468] sm:$0xff] }
  0x41   :  { %488 = vmatprep.subr.mxu0 %v5003_v38  ;;  %6576 = vst [vmem:[#allocation15_spill] sm:$0xff] %v5015_v0  ;;  %v5027_v38 = vld [vmem:[%s6456_s3 + $0x428] sm:$0xff] }
  0x42   :  { %6578 = vst [vmem:[#allocation17_spill] sm:$0xff] %v5027_v38 }
  0xe1   :  { %v5017_v41 = vpop.f32.mrf.mxu0 }
  0xe2   :  { %340 = vmatmul.mubr.f32.vlgmr.msra.gmra.mxu1 %v5017_v41  ;;  %411 = vmatmul.mubr.f32.vlgmr.msra.gmra.mxu0 %v5017_v41 }
  0xe3   :  { %418 = vmatpush1.msra.mxu1 %v5010_v43  ;;  %489 = vmatpush1.msra.mxu0 %v5015_v0  ;;  %v4013_v23 = vpop.f32.mrf.mxu0  ;;  %v5058_v43 = vld [vmem:[%s6456_s3 + $0x3c8] sm:$0xff] }
  0xe4   :  { %419 = vmatprep.subr.mxu1 %v5022_v32  ;;  %490 = vmatprep.subr.mxu0 %v5027_v38  ;;  %6583 = vst [vmem:[#allocation22_spill] sm:$0xff] %v5058_v43  ;;  %v5063_v23 = vld [vmem:[%s6456_s3 + $0x3d8] sm:$0xff]  ;;  %v5070_v32 = vld [vmem:[%s6456_s3 + $0x388] sm:$0xff] }
  0xe5   :  { %6584 = vst [vmem:[#allocation23_spill] sm:$0xff] %v5063_v23  ;;  %420 = vmatpush1.msra.mxu1 %v5034_v29  ;;  %491 = vmatpush1.msra.mxu0 %v5039_v26  ;;  %6585 = vst [vmem:[#allocation24_spill] sm:$0xff] %v5070_v32  ;;  %v5075_v38 = vld [vmem:[%s6456_s3 + $0x398] sm:$0xff]  ;;  %v5082_v29 = vld [vmem:[%s6456_s3 + $0x380] sm:$0xff] }
  0xe6   :  { %6586 = vst [vmem:[#allocation25_spill] sm:$0xff] %v5075_v38  ;;  %421 = vmatprep.subr.mxu1 %v5046_v20  ;;  %492 = vmatprep.subr.mxu0 %v5051_v17  ;;  %6587 = vst [vmem:[#allocation26_spill] sm:$0xff] %v5082_v29  ;;  %v5087_v26 = vld [vmem:[%s6456_s3 + $0x390] sm:$0xff]  ;;  %v5094_v20 = vld [vmem:[%s6456_s3 + $0x340] sm:$0xff] }
  0xe7   :  { %6588 = vst [vmem:[#allocation27_spill] sm:$0xff] %v5087_v26  ;;  %422 = vmatpush1.msra.mxu1 %v5058_v43  ;;  %493 = vmatpush1.msra.mxu0 %v5063_v23  ;;  %6589 = vst [vmem:[#allocation28_spill] sm:$0xff] %v5094_v20  ;;  %v5099_v17 = vld [vmem:[%s6456_s3 + $0x350] sm:$0xff]  ;;  %v5106_v43 = vld [vmem:[%s6456_s3 + $0x338] sm:$0xff] }
  0xe8   :  { %6590 = vst [vmem:[#allocation29_spill] sm:$0xff] %v5099_v17  ;;  %423 = vmatprep.subr.mxu1 %v5070_v32  ;;  %494 = vmatprep.subr.mxu0 %v5075_v38  ;;  %6591 = vst [vmem:[#allocation30_spill] sm:$0xff] %v5106_v43  ;;  %v5111_v23 = vld [vmem:[%s6456_s3 + $0x348] sm:$0xff]  ;;  %v5118_v32 = vld [vmem:[%s6456_s3 + $0x2f8] sm:$0xff] }
  0xe9   :  { %6592 = vst [vmem:[#allocation31_spill] sm:$0xff] %v5111_v23  ;;  %424 = vmatpush1.msra.mxu1 %v5082_v29  ;;  %495 = vmatpush1.msra.mxu0 %v5087_v26  ;;  %6593 = vst [vmem:[#allocation32_spill] sm:$0xff] %v5118_v32  ;;  %v5123_v38 = vld [vmem:[%s6456_s3 + $0x308] sm:$0xff]  ;;  %v5130_v29 = vld [vmem:[%s6456_s3 + $0x2f0] sm:$0xff] }
  0xea   :  { %6594 = vst [vmem:[#allocation33_spill] sm:$0xff] %v5123_v38  ;;  %425 = vmatprep.subr.mxu1 %v5094_v20  ;;  %496 = vmatprep.subr.mxu0 %v5099_v17  ;;  %6595 = vst [vmem:[#allocation34_spill] sm:$0xff] %v5130_v29  ;;  %v5135_v26 = vld [vmem:[%s6456_s3 + $0x300] sm:$0xff]  ;;  %v5142_v20 = vld [vmem:[%s6456_s3 + $0x2b0] sm:$0xff] }
  0xeb   :  { %6596 = vst [vmem:[#allocation35_spill] sm:$0xff] %v5135_v26  ;;  %426 = vmatpush1.msra.mxu1 %v5106_v43  ;;  %497 = vmatpush1.msra.mxu0 %v5111_v23  ;;  %6597 = vst [vmem:[#allocation36_spill] sm:$0xff] %v5142_v20  ;;  %v5147_v17 = vld [vmem:[%s6456_s3 + $0x2c0] sm:$0xff]  ;;  %v5154_v43 = vld [vmem:[%s6456_s3 + $0x2a8] sm:$0xff] }
  0xec   :  { %6598 = vst [vmem:[#allocation37_spill] sm:$0xff] %v5147_v17  ;;  %427 = vmatprep.subr.mxu1 %v5118_v32  ;;  %498 = vmatprep.subr.mxu0 %v5123_v38  ;;  %6599 = vst [vmem:[#allocation38_spill] sm:$0xff] %v5154_v43  ;;  %v5159_v23 = vld [vmem:[%s6456_s3 + $0x2b8] sm:$0xff]  ;;  %v5166_v32 = vld [vmem:[%s6456_s3 + $0x268] sm:$0xff] }
  0xed   :  { %6600 = vst [vmem:[#allocation39_spill] sm:$0xff] %v5159_v23  ;;  %428 = vmatpush1.msra.mxu1 %v5130_v29  ;;  %499 = vmatpush1.msra.mxu0 %v5135_v26  ;;  %6601 = vst [vmem:[#allocation40_spill] sm:$0xff] %v5166_v32  ;;  %v5171_v38 = vld [vmem:[%s6456_s3 + $0x278] sm:$0xff]  ;;  %v5178_v29 = vld [vmem:[%s6456_s3 + $0x260] sm:$0xff] }
  0xee   :  { %6602 = vst [vmem:[#allocation41_spill] sm:$0xff] %v5171_v38  ;;  %429 = vmatprep.subr.mxu1 %v5142_v20  ;;  %500 = vmatprep.subr.mxu0 %v5147_v17  ;;  %6603 = vst [vmem:[#allocation42_spill] sm:$0xff] %v5178_v29  ;;  %v5183_v26 = vld [vmem:[%s6456_s3 + $0x270] sm:$0xff]  ;;  %v5190_v20 = vld [vmem:[%s6456_s3 + $0x220] sm:$0xff] }
  0xef   :  { %6604 = vst [vmem:[#allocation43_spill] sm:$0xff] %v5183_v26  ;;  %430 = vmatpush1.msra.mxu1 %v5154_v43  ;;  %501 = vmatpush1.msra.mxu0 %v5159_v23  ;;  %6605 = vst [vmem:[#allocation44_spill] sm:$0xff] %v5190_v20  ;;  %v5195_v17 = vld [vmem:[%s6456_s3 + $0x230] sm:$0xff]  ;;  %v5202_v43 = vld [vmem:[%s6456_s3 + $0x218] sm:$0xff] }
  0xf0   :  { %6606 = vst [vmem:[#allocation45_spill] sm:$0xff] %v5195_v17  ;;  %431 = vmatprep.subr.mxu1 %v5166_v32  ;;  %502 = vmatprep.subr.mxu0 %v5171_v38  ;;  %6607 = vst [vmem:[#allocation46_spill] sm:$0xff] %v5202_v43  ;;  %v5207_v23 = vld [vmem:[%s6456_s3 + $0x228] sm:$0xff]  ;;  %v5214_v32 = vld [vmem:[%s6456_s3 + $0x1d8] sm:$0xff] }
  0xf1   :  { %6608 = vst [vmem:[#allocation47_spill] sm:$0xff] %v5207_v23  ;;  %432 = vmatpush1.msra.mxu1 %v5178_v29  ;;  %503 = vmatpush1.msra.mxu0 %v5183_v26  ;;  %6609 = vst [vmem:[#allocation48_spill] sm:$0xff] %v5214_v32  ;;  %v5219_v38 = vld [vmem:[%s6456_s3 + $0x1e8] sm:$0xff]  ;;  %v5226_v29 = vld [vmem:[%s6456_s3 + $0x1d0] sm:$0xff] }
  0xf2   :  { %6610 = vst [vmem:[#allocation49_spill] sm:$0xff] %v5219_v38  ;;  %433 = vmatprep.subr.mxu1 %v5190_v20  ;;  %504 = vmatprep.subr.mxu0 %v5195_v17  ;;  %6611 = vst [vmem:[#allocation50_spill] sm:$0xff] %v5226_v29  ;;  %v5231_v26 = vld [vmem:[%s6456_s3 + $0x1e0] sm:$0xff]  ;;  %v5238_v20 = vld [vmem:[%s6456_s3 + $0x190] sm:$0xff] }
  0xf3   :  { %6612 = vst [vmem:[#allocation51_spill] sm:$0xff] %v5231_v26  ;;  %434 = vmatpush1.msra.mxu1 %v5202_v43  ;;  %505 = vmatpush1.msra.mxu0 %v5207_v23  ;;  %6613 = vst [vmem:[#allocation52_spill] sm:$0xff] %v5238_v20  ;;  %v5243_v17 = vld [vmem:[%s6456_s3 + $0x1a0] sm:$0xff]  ;;  %v5250_v43 = vld [vmem:[%s6456_s3 + $0x188] sm:$0xff] }
  0xf4   :  { %6614 = vst [vmem:[#allocation53_spill] sm:$0xff] %v5243_v17  ;;  %435 = vmatprep.subr.mxu1 %v5214_v32  ;;  %506 = vmatprep.subr.mxu0 %v5219_v38  ;;  %6615 = vst [vmem:[#allocation54_spill] sm:$0xff] %v5250_v43  ;;  %v5255_v23 = vld [vmem:[%s6456_s3 + $0x198] sm:$0xff]  ;;  %v5262_v32 = vld [vmem:[%s6456_s3 + $0x148] sm:$0xff] }
  0xf5   :  { %6616 = vst [vmem:[#allocation55_spill] sm:$0xff] %v5255_v23  ;;  %436 = vmatpush1.msra.mxu1 %v5226_v29  ;;  %507 = vmatpush1.msra.mxu0 %v5231_v26  ;;  %6617 = vst [vmem:[#allocation56_spill] sm:$0xff] %v5262_v32  ;;  %v5267_v38 = vld [vmem:[%s6456_s3 + $0x158] sm:$0xff]  ;;  %v5274_v29 = vld [vmem:[%s6456_s3 + $0x140] sm:$0xff] }
  0xf6   :  { %6618 = vst [vmem:[#allocation57_spill] sm:$0xff] %v5267_v38  ;;  %437 = vmatprep.subr.mxu1 %v5238_v20  ;;  %508 = vmatprep.subr.mxu0 %v5243_v17  ;;  %6619 = vst [vmem:[#allocation58_spill] sm:$0xff] %v5274_v29  ;;  %v5279_v26 = vld [vmem:[%s6456_s3 + $0x150] sm:$0xff]  ;;  %v5286_v20 = vld [vmem:[%s6456_s3 + $0x100] sm:$0xff] }
  0xf7   :  { %6620 = vst [vmem:[#allocation59_spill] sm:$0xff] %v5279_v26  ;;  %438 = vmatpush1.msra.mxu1 %v5250_v43  ;;  %509 = vmatpush1.msra.mxu0 %v5255_v23  ;;  %6621 = vst [vmem:[#allocation60_spill] sm:$0xff] %v5286_v20  ;;  %v5291_v17 = vld [vmem:[%s6456_s3 + $0x110] sm:$0xff]  ;;  %v5298_v43 = vld [vmem:[%s6456_s3 + $0xf8] sm:$0xff] }
  0xf8   :  { %6622 = vst [vmem:[#allocation61_spill] sm:$0xff] %v5291_v17  ;;  %439 = vmatprep.subr.mxu1 %v5262_v32  ;;  %510 = vmatprep.subr.mxu0 %v5267_v38  ;;  %6623 = vst [vmem:[#allocation62_spill] sm:$0xff] %v5298_v43  ;;  %v5303_v23 = vld [vmem:[%s6456_s3 + $0x108] sm:$0xff]  ;;  %v5310_v32 = vld [vmem:[%s6456_s3 + $0xb8] sm:$0xff] }
  0xf9   :  { %6624 = vst [vmem:[#allocation63_spill] sm:$0xff] %v5303_v23  ;;  %440 = vmatpush1.msra.mxu1 %v5274_v29  ;;  %511 = vmatpush1.msra.mxu0 %v5279_v26  ;;  %6625 = vst [vmem:[#allocation64_spill] sm:$0xff] %v5310_v32  ;;  %v5315_v38 = vld [vmem:[%s6456_s3 + $0xc8] sm:$0xff]  ;;  %v5322_v29 = vld [vmem:[%s6456_s3 + $0xb0] sm:$0xff] }
  0xfa   :  { %6626 = vst [vmem:[#allocation65_spill] sm:$0xff] %v5315_v38  ;;  %441 = vmatprep.subr.mxu1 %v5286_v20  ;;  %512 = vmatprep.subr.mxu0 %v5291_v17  ;;  %6627 = vst [vmem:[#allocation66_spill] sm:$0xff] %v5322_v29  ;;  %v5327_v26 = vld [vmem:[%s6456_s3 + $0xc0] sm:$0xff]  ;;  %v5334_v20 = vld [vmem:[%s6456_s3 + $0x70] sm:$0xff] }
  0xfb   :  { %6628 = vst [vmem:[#allocation67_spill] sm:$0xff] %v5327_v26  ;;  %442 = vmatpush1.msra.mxu1 %v5298_v43  ;;  %513 = vmatpush1.msra.mxu0 %v5303_v23  ;;  %6629 = vst [vmem:[#allocation68_spill] sm:$0xff] %v5334_v20  ;;  %v5339_v17 = vld [vmem:[%s6456_s3 + $0x80] sm:$0xff]  ;;  %v5346_v43 = vld [vmem:[%s6456_s3 + $0x68] sm:$0xff] }
  0xfc   :  { %6630 = vst [vmem:[#allocation69_spill] sm:$0xff] %v5339_v17  ;;  %443 = vmatprep.subr.mxu1 %v5310_v32  ;;  %514 = vmatprep.subr.mxu0 %v5315_v38  ;;  %6631 = vst [vmem:[#allocation70_spill] sm:$0xff] %v5346_v43  ;;  %v5351_v23 = vld [vmem:[%s6456_s3 + $0x78] sm:$0xff]  ;;  %v5358_v32 = vld [vmem:[%s6456_s3 + $0x28] sm:$0xff] }
  0xfd   :  { %6632 = vst [vmem:[#allocation71_spill] sm:$0xff] %v5351_v23  ;;  %444 = vmatpush1.msra.mxu1 %v5322_v29  ;;  %515 = vmatpush1.msra.mxu0 %v5327_v26  ;;  %6633 = vst [vmem:[#allocation72_spill] sm:$0xff] %v5358_v32  ;;  %v5363_v38 = vld [vmem:[%s6456_s3 + $0x38] sm:$0xff]  ;;  %v5370_v29 = vld [vmem:[%s6456_s3 + $0x20] sm:$0xff] }
  0xfe   :  { %6634 = vst [vmem:[#allocation73_spill] sm:$0xff] %v5363_v38  ;;  %445 = vmatprep.subr.mxu1 %v5334_v20  ;;  %516 = vmatprep.subr.mxu0 %v5339_v17  ;;  %6635 = vst [vmem:[#allocation74_spill] sm:$0xff] %v5370_v29  ;;  %v5377_v26 = vld [vmem:[%s6456_s3 + $0x30] sm:$0xff]  ;;  %v6637_v17 = vmov 0.0  }
  0xff   :  { %446 = vmatpush1.msra.mxu1 %v5346_v43  ;;  %517 = vmatpush1.msra.mxu0 %v5351_v23  ;;  %6636 = vst [vmem:[#allocation75_spill] sm:$0xff] %v5377_v26  ;;  %v5388_v23 = vld [vmem:[%s6456_s3 + $0x478] sm:$0xff] }
 0x100   :  { %447 = vmatprep.subr.mxu1 %v5358_v32  ;;  %518 = vmatprep.subr.mxu0 %v5363_v38  ;;  %6638 = vst [vmem:[#allocation76_spill] sm:$0xff] %v5388_v23  ;;  %v5422_v38 = vld [vmem:[%s6456_s3 + $0x358] sm:$0xff] }
 0x101   :  { %448 = vmatpush1.msra.mxu1 %v5370_v29  ;;  %481 = vmatprep.mubr.f32.mxu1 %v6637_v17  ;;  %v5396_v29 = vld [vmem:[%s6456_s3 + $0x430] sm:$0xff]  ;;  %6642 = vst [vmem:[#allocation80_spill] sm:$0xff] %v5422_v38 }
 0x102   :  { %519 = vmatpush1.msra.mxu0 %v5377_v26  ;;  %552 = vmatprep.mubr.f32.mxu0 %v6637_v17  ;;  %6639 = vst [vmem:[#allocation77_spill] sm:$0xff] %v5396_v29  ;;  %v5406_v26 = vld [vmem:[%s6456_s3 + $0x3e8] sm:$0xff] }
 0x103   :  { %482 = vmatmul.mubr.f32.vlgmr.msra.gmra.mxu1 %v5017_v41  ;;  %553 = vmatmul.mubr.f32.vlgmr.msra.gmra.mxu0 %v5017_v41  ;;  %6640 = vst [vmem:[#allocation78_spill] sm:$0xff] %v5406_v26 }
 0x104   :  { %4014 = vmatprep.subr.mxu1 %v6637_v17  ;;  %4046 = vmatprep.mubr.msk.f32.mxu1 %vm4466_vm0, %v6637_v17 }
 0x105   :  { %4015 = vmatpush3.msra.mxu1 %v5388_v23  ;;  %4049 = vmatprep.subr.mxu0 %v6637_v17  ;;  %v5415_v23 = vld [vmem:[%s6456_s3 + $0x3a0] sm:$0xff] }
 0x106   :  { %4016 = vmatprep.subr.mxu1 %v6637_v17  ;;  %4051 = vmatprep.mubr.msk.f32.mxu0 %vm4466_vm0, %v6637_v17  ;;  %6641 = vst [vmem:[#allocation79_spill] sm:$0xff] %v5415_v23 }
 0x107   :  { %4017 = vmatpush3.msra.mxu1 %v5396_v29  ;;  %v5429_v29 = vld [vmem:[%s6456_s3 + $0x310] sm:$0xff] }
 0x108   :  { %4018 = vmatprep.subr.mxu1 %v6637_v17  ;;  %6643 = vst [vmem:[#allocation81_spill] sm:$0xff] %v5429_v29 }
 0x109   :  { %4019 = vmatpush3.msra.mxu1 %v5406_v26  ;;  %v5436_v26 = vld [vmem:[%s6456_s3 + $0x2c8] sm:$0xff] }
 0x10a   :  { %4020 = vmatprep.subr.mxu1 %v6637_v17  ;;  %6644 = vst [vmem:[#allocation82_spill] sm:$0xff] %v5436_v26 }
 0x10b   :  { %4021 = vmatpush3.msra.mxu1 %v5415_v23  ;;  %v5443_v23 = vld [vmem:[%s6456_s3 + $0x280] sm:$0xff] }
 0x10c   :  { %4022 = vmatprep.subr.mxu1 %v6637_v17  ;;  %6645 = vst [vmem:[#allocation83_spill] sm:$0xff] %v5443_v23 }
 0x10d   :  { %4023 = vmatpush3.msra.mxu1 %v5422_v38  ;;  %v5450_v38 = vld [vmem:[%s6456_s3 + $0x238] sm:$0xff] }
 0x10e   :  { %4024 = vmatprep.subr.mxu1 %v6637_v17  ;;  %6646 = vst [vmem:[#allocation84_spill] sm:$0xff] %v5450_v38 }
 0x10f   :  { %4025 = vmatpush3.msra.mxu1 %v5429_v29  ;;  %v5457_v29 = vld [vmem:[%s6456_s3 + $0x1f0] sm:$0xff] }
 0x110   :  { %4026 = vmatprep.subr.mxu1 %v6637_v17  ;;  %6647 = vst [vmem:[#allocation85_spill] sm:$0xff] %v5457_v29 }
 0x111   :  { %4027 = vmatpush3.msra.mxu1 %v5436_v26  ;;  %v5464_v26 = vld [vmem:[%s6456_s3 + $0x1a8] sm:$0xff] }
 0x112   :  { %4028 = vmatprep.subr.mxu1 %v6637_v17  ;;  %6648 = vst [vmem:[#allocation86_spill] sm:$0xff] %v5464_v26 }
 0x113   :  { %4029 = vmatpush3.msra.mxu1 %v5443_v23  ;;  %v5471_v23 = vld [vmem:[%s6456_s3 + $0x160] sm:$0xff] }
 0x114   :  { %4030 = vmatprep.subr.mxu1 %v6637_v17  ;;  %6649 = vst [vmem:[#allocation87_spill] sm:$0xff] %v5471_v23 }
 0x115   :  { %4031 = vmatpush3.msra.mxu1 %v5450_v38  ;;  %v5478_v38 = vld [vmem:[%s6456_s3 + $0x118] sm:$0xff] }
 0x116   :  { %4032 = vmatprep.subr.mxu1 %v6637_v17  ;;  %6650 = vst [vmem:[#allocation88_spill] sm:$0xff] %v5478_v38 }
 0x117   :  { %4033 = vmatpush3.msra.mxu1 %v5457_v29  ;;  %v5485_v29 = vld [vmem:[%s6456_s3 + $0xd0] sm:$0xff] }
 0x118   :  { %4034 = vmatprep.subr.mxu1 %v6637_v17  ;;  %6651 = vst [vmem:[#allocation89_spill] sm:$0xff] %v5485_v29 }
 0x119   :  { %4035 = vmatpush3.msra.mxu1 %v5464_v26  ;;  %v5492_v26 = vld [vmem:[%s6456_s3 + $0x88] sm:$0xff] }
 0x11a   :  { %4036 = vmatprep.subr.mxu1 %v6637_v17  ;;  %6652 = vst [vmem:[#allocation90_spill] sm:$0xff] %v5492_v26 }
 0x11b   :  { %4037 = vmatpush3.msra.mxu1 %v5471_v23  ;;  %v5499_v23 = vld [vmem:[%s6456_s3 + $0x40] sm:$0xff] }
 0x11c   :  { %4038 = vmatprep.subr.mxu1 %v6637_v17  ;;  %6653 = vst [vmem:[#allocation91_spill] sm:$0xff] %v5499_v23 }
 0x11d   :  { %4039 = vmatpush3.msra.mxu1 %v5478_v38  ;;  %v5512_v38 = vld [vmem:[%s6458_s6] sm:$0xf] }
 0x11e   :  { %4040 = vmatprep.subr.mxu1 %v6637_v17 }
 0x11f   :  { %4041 = vmatpush3.msra.mxu1 %v5485_v29  ;;  %v6558_v29 = vmov 0  }
 0x120   :  { %4042 = vmatprep.subr.mxu1 %v6637_v17  ;;  %4306 = vset.pattern.permute.xlu0 %v6558_v29 }
 0x121   :  { %4043 = vmatpush3.msra.mxu1 %v5492_v26  ;;  %1330 = vperm.xlu0 %4306, %v5512_v38  }
 0x122   :  { %4044 = vmatprep.subr.mxu1 %v6637_v17 }
 0x123   :  { %4045 = vmatpush3.msra.mxu1 %v5499_v23  ;;  %v629_v23 = vld [vmem:[%s6459_s5] sm:$0xff] }
 0x124   :  { %4047 = vmatmul.mubr.f32.vlgmr.msra.gmra.mxu1 %v5017_v41  ;;  %4084 = vmatprep.subr.mxu1 %v6637_v17  ;;  %v635_v26 = vrot.slane %v629_v23, 4 }
 0x125   :  { %4086 = vmatprep.mubr.msk.f32.mxu1 %vm4466_vm0, %v6637_v17 }
 0x1a2   :  { %v341_v41 = vpop.f32.mrf.mxu1  ;;  %v412_v29 = vpop.f32.mrf.mxu0 }
 0x1a4   :  { %v343_v32 = vpop.f32.mrf.mxu1 }
 0x1a5   :  { %4050 = vmatpush3.msk.msra.mxu0 %vm639_vm1, %v343_v32  ;;  %v414_v32 = vpop.f32.mrf.mxu0 }
 0x1a6   :  { %4052 = vmatmul.mubr.msk.f32.vlgmr.msra.gmra.mxu0 %vm636_vm2, %v635_v26  ;;  %4054 = vmatprep.subr.mxu0 %v6637_v17  ;;  %v630_v26 = vld [vmem:[%s6459_s5 + $0x8] sm:$0xff] }
 0x1a7   :  { %4055 = vmatpush3.msk.msra.mxu0 %vm639_vm1, %v341_v41  ;;  %4056 = vmatprep.mubr.msk.f32.mxu0 %vm4466_vm0, %v6637_v17  ;;  %v865_v41 = vrot.slane %v630_v26, 4 }
 0x1a8   :  { %4059 = vmatprep.subr.mxu0 %v6637_v17 }
 0x1aa   :  { %4057 = vmatmul.mubr.msk.f32.vlgmr.msra.gmra.mxu0 %vm636_vm2, %v629_v23  ;;  %v631_v23 = vld [vmem:[%s6459_s5 + $0x10] sm:$0xff] }
 0x1ab   :  { %4060 = vmatpush3.msk.msra.mxu0 %vm639_vm1, %v412_v29  ;;  %4061 = vmatprep.mubr.msk.f32.mxu0 %vm4466_vm0, %v6637_v17  ;;  %v632_v29 = vld [vmem:[%s6459_s5 + $0x18] sm:$0xff] }
 0x1ac   :  { %4064 = vmatprep.subr.mxu0 %v6637_v17  ;;  %v1173_v43 = vrot.slane %v632_v29, 4 }
 0x1ae   :  { %4062 = vmatmul.mubr.msk.f32.vlgmr.msra.gmra.mxu0 %vm636_vm2, %v630_v26 }
 0x1af   :  { %4065 = vmatpush3.msk.msra.mxu0 %vm639_vm1, %v414_v32  ;;  %4066 = vmatprep.mubr.msk.f32.mxu0 %vm4466_vm0, %v6637_v17 }
 0x1b0   :  { %4069 = vmatprep.subr.mxu0 %v6637_v17 }
 0x1b2   :  { %4067 = vmatmul.mubr.msk.f32.vlgmr.msra.gmra.mxu0 %vm636_vm2, %v865_v41  ;;  %v1019_v41 = vrot.slane %v631_v23, 4 }
 0x1b3   :  { %4071 = vmatprep.mubr.msk.f32.mxu0 %vm4466_vm0, %v6637_v17 }
 0x1c3   :  { %v483_v26 = vpop.f32.mrf.mxu1  ;;  %v554_v32 = vpop.f32.mrf.mxu0 }
 0x1c4   :  { %4070 = vmatpush3.msk.msra.mxu0 %vm639_vm1, %v483_v26 }
 0x1c5   :  { %v485_v20 = vpop.f32.mrf.mxu1  ;;  %v556_v0 = vpop.f32.mrf.mxu0  ;;  %4072 = vmatmul.mubr.msk.f32.vlgmr.msra.gmra.mxu0 %vm636_vm2, %v631_v23  ;;  %4074 = vmatprep.subr.mxu0 %v6637_v17 }
 0x1c6   :  { %4075 = vmatpush3.msk.msra.mxu0 %vm639_vm1, %v485_v20  ;;  %4085 = vmatpush3.msk.msra.mxu1 %vm639_vm1, %v556_v0  ;;  %v633_v0 = vld [vmem:[%s6459_s5 + $0x20] sm:$0xf] }
 0x1c7   :  { %4076 = vmatprep.mubr.msk.f32.mxu0 %vm4466_vm0, %v6637_v17  ;;  %4079 = vmatprep.subr.mxu0 %v6637_v17 }
 0x1c8   :  { %4087 = vmatmul.mubr.msk.f32.vlgmr.msra.gmra.mxu1 %vm636_vm2, %v1173_v43  ;;  %1361 = vmatprep.subr.mxu1 %v4561_v5  ;;  %v6666_v43 = vmov 0  }
 0x1c9   :  { %4077 = vmatmul.mubr.msk.f32.vlgmr.msra.gmra.mxu0 %vm636_vm2, %v1019_v41  ;;  %1362 = vmatpush1.msra.mxu1 %v4571_v7 }
 0x1ca   :  { %4080 = vmatpush3.msk.msra.mxu0 %vm639_vm1, %v554_v32  ;;  %4081 = vmatprep.mubr.msk.f32.mxu0 %vm4466_vm0, %v6637_v17 }
 0x1cb   :  { %4089 = vmatprep.subr.mxu0 %v6637_v17  ;;  %1363 = vmatprep.subr.mxu1 %v4577_v8  ;;  %v6654_v8 = vld [vmem:[#allocation2_spill] sm:$0xff] }
 0x1cc   :  { %1364 = vmatpush1.msra.mxu1 %v4582_v9  ;;  %1425 = vmatprep.mubr.f32.mxu1 %v6637_v17  ;;  %v6655_v9 = vld [vmem:[#allocation3_spill] sm:$0xff] }
 0x1cd   :  { %4082 = vmatmul.mubr.msk.f32.vlgmr.msra.gmra.mxu0 %vm636_vm2, %v632_v29  ;;  %1365 = vmatprep.subr.mxu1 %v4592_v11  ;;  %v6656_v11 = vld [vmem:[#allocation4_spill] sm:$0xff] }
 0x1ce   :  { %4091 = vmatprep.mubr.msk.f32.mxu0 %vm4466_vm0, %v6637_v17  ;;  %1366 = vmatpush1.msra.mxu1 %v4598_v12  ;;  %v6657_v12 = vld [vmem:[#allocation5_spill] sm:$0xff] }
 0x1cf   :  { %1367 = vmatprep.subr.mxu1 %v4603_v13  ;;  %v6658_v13 = vld [vmem:[#allocation6_spill] sm:$0xff] }
 0x1d0   :  { %1368 = vmatpush1.msra.mxu1 %v4613_v15  ;;  %v6659_v15 = vld [vmem:[#allocation7_spill] sm:$0xff] }
 0x1d1   :  { %1369 = vmatprep.subr.mxu1 %v4619_v16  ;;  %v6660_v16 = vld [vmem:[#allocation8_spill] sm:$0xff] }
 0x1d2   :  { %1370 = vmatpush1.msra.mxu1 %v4629_v18  ;;  %v6661_v18 = vld [vmem:[#allocation9_spill] sm:$0xff] }
 0x1d3   :  { %1371 = vmatprep.subr.mxu1 %v4635_v19  ;;  %v6662_v19 = vld [vmem:[#allocation10_spill] sm:$0xff] }
 0x1d4   :  { %1372 = vmatpush1.msra.mxu1 %v4645_v21  ;;  %v6663_v21 = vld [vmem:[#allocation11_spill] sm:$0xff] }
 0x1d5   :  { %1373 = vmatprep.subr.mxu1 %v4651_v22  ;;  %v6664_v22 = vld [vmem:[#allocation12_spill] sm:$0xff] }
 0x1d6   :  { %1374 = vmatpush1.msra.mxu1 %v4661_v24  ;;  %v6665_v24 = vld [vmem:[#allocation13_spill] sm:$0xff] }
 0x1d7   :  { %1375 = vmatprep.subr.mxu1 %v4667_v25 }
 0x1d8   :  { %1376 = vmatpush1.msra.mxu1 %v4677_v27 }
 0x1d9   :  { %1377 = vmatprep.subr.mxu1 %v4683_v28 }
 0x1da   :  { %1378 = vmatpush1.msra.mxu1 %v4693_v30 }
 0x1db   :  { %1379 = vmatprep.subr.mxu1 %v4699_v31 }
 0x1dc   :  { %1380 = vmatpush1.msra.mxu1 %v4709_v33 }
 0x1dd   :  { %1381 = vmatprep.subr.mxu1 %v4715_v34 }
 0x1de   :  { %1382 = vmatpush1.msra.mxu1 %v4725_v36 }
 0x1df   :  { %1383 = vmatprep.subr.mxu1 %v4731_v37 }
 0x1e0   :  { %1384 = vmatpush1.msra.mxu1 %v4741_v39 }
 0x1e1   :  { %1385 = vmatprep.subr.mxu1 %v4747_v40 }
 0x1e2   :  { %1386 = vmatpush1.msra.mxu1 %v4757_v42 }
 0x1e3   :  { %1387 = vmatprep.subr.mxu1 %v4778_v46 }
 0x1e4   :  { %v625_v5 = vpop.f32.mrf.mxu1  ;;  %1388 = vmatpush1.msra.mxu1 %v4789_v48 }
 0x1e5   :  { %4090 = vmatpush3.msk.msra.mxu0 %vm639_vm1, %v625_v5  ;;  %1389 = vmatprep.subr.mxu1 %v4800_v50  ;;  %v6668_v5 = vld [vmem:[#allocation15_spill] sm:$0xff] }
 0x1e6   :  { %v4048_v7 = vpop.f32.mrf.mxu1  ;;  %4092 = vmatmul.mubr.msk.f32.vlgmr.msra.gmra.mxu0 %vm636_vm2, %v633_v0  ;;  %1432 = vmatprep.subr.mxu0 %v4765_v44  ;;  %v6667_v0 = vld [vmem:[#allocation14_spill] sm:$0xff] }
 0x1e7   :  { %1433 = vmatpush1.msra.mxu0 %v4772_v45  ;;  %1390 = vmatpush1.msra.mxu1 %v4812_v52  ;;  %v6669_v7 = vld [vmem:[#allocation16_spill] sm:$0xff] }
 0x1e8   :  { %1434 = vmatprep.subr.mxu0 %v4783_v47  ;;  %1391 = vmatprep.subr.mxu1 %v4824_v54 }
 0x1e9   :  { %1435 = vmatpush1.msra.mxu0 %v4795_v49  ;;  %1392 = vmatpush1.msra.mxu1 %v4836_v56  ;;  %v1331_v56 = vpop.permute.xlu0 %1330 }
 0x1ea   :  { %1436 = vmatprep.subr.mxu0 %v4806_v51  ;;  %1496 = vmatprep.mubr.f32.mxu0 %v6637_v17 }
 0x1eb   :  { %1437 = vmatpush1.msra.mxu0 %v4818_v53  ;;  %1503 = vmatprep.subr.mxu1 %v4998_v35  ;;  %v4469_v35 = vmov 2  }
 0x1ec   :  { %1438 = vmatprep.subr.mxu0 %v4830_v55 }
 0x1ed   :  { %1439 = vmatpush1.msra.mxu0 %v4842_v57 }
 0x1ee   :  { %1440 = vmatprep.subr.mxu0 %v4849_v58 }
 0x1ef   :  { %1441 = vmatpush1.msra.mxu0 %v4856_v59 }
 0x1f0   :  { %1442 = vmatprep.subr.mxu0 %v4863_v60 }
 0x1f1   :  { %1443 = vmatpush1.msra.mxu0 %v4870_v61 }
 0x1f2   :  { %1444 = vmatprep.subr.mxu0 %v4876_v62 }
 0x1f3   :  { %1445 = vmatpush1.msra.mxu0 %v4882_v63 }
 0x1f4   :  { %1446 = vmatprep.subr.mxu0 %v4888_v1 }
 0x1f5   :  { %1447 = vmatpush1.msra.mxu0 %v4894_v2 }
 0x1f6   :  { %1448 = vmatprep.subr.mxu0 %v4900_v3  ;;  %v4468_v3 = vmov 1  }
 0x1f7   :  { %1449 = vmatpush1.msra.mxu0 %v4906_v4  ;;  %4307 = vset.pattern.permute.xlu1 %v4468_v3 }
 0x1f8   :  { %1450 = vmatprep.subr.mxu0 %v4912_v6  ;;  %4310 = vset.pattern.permute.xlu0 %v4468_v3  ;;  %v6717_v3 = vld [vmem:[#allocation64_spill] sm:$0xff] }
 0x1f9   :  { %1451 = vmatpush1.msra.mxu0 %v4918_v10 }
 0x1fa   :  { %1452 = vmatprep.subr.mxu0 %v4924_v14 }
 0x1fb   :  { %1453 = vmatpush1.msra.mxu0 %v6654_v8  ;;  %v6670_v8 = vld [vmem:[#allocation17_spill] sm:$0xff] }
 0x1fc   :  { %1454 = vmatprep.subr.mxu0 %v6655_v9  ;;  %v6672_v9 = vld [vmem:[#allocation19_spill] sm:$0xff] }
 0x1fd   :  { %1455 = vmatpush1.msra.mxu0 %v6656_v11  ;;  %v6673_v11 = vld [vmem:[#allocation20_spill] sm:$0xff] }
 0x1fe   :  { %1456 = vmatprep.subr.mxu0 %v6657_v12  ;;  %v6674_v12 = vld [vmem:[#allocation21_spill] sm:$0xff] }
 0x1ff   :  { %1457 = vmatpush1.msra.mxu0 %v6658_v13  ;;  %v6675_v13 = vld [vmem:[#allocation22_spill] sm:$0xff] }
 0x200   :  { %1458 = vmatprep.subr.mxu0 %v6659_v15  ;;  %v6676_v15 = vld [vmem:[#allocation23_spill] sm:$0xff] }
 0x201   :  { %1459 = vmatpush1.msra.mxu0 %v6660_v16  ;;  %v6677_v16 = vld [vmem:[#allocation24_spill] sm:$0xff] }
 0x202   :  { %1460 = vmatprep.subr.mxu0 %v6661_v18  ;;  %v6678_v18 = vld [vmem:[#allocation25_spill] sm:$0xff] }
 0x203   :  { %1461 = vmatpush1.msra.mxu0 %v6662_v19  ;;  %v6679_v19 = vld [vmem:[#allocation26_spill] sm:$0xff] }
 0x204   :  { %1462 = vmatprep.subr.mxu0 %v6663_v21  ;;  %v6680_v21 = vld [vmem:[#allocation27_spill] sm:$0xff] }
 0x205   :  { %1463 = vmatpush1.msra.mxu0 %v6664_v22  ;;  %v6681_v22 = vld [vmem:[#allocation28_spill] sm:$0xff] }
 0x206   :  { %1574 = vmatprep.subr.mxu0 %v6665_v24  ;;  %v6682_v24 = vld [vmem:[#allocation29_spill] sm:$0xff] }
 0x266   :  { %v709_v25 = vpop.f32.mrf.mxu0 }
 0x268   :  { %v4053_v27 = vpop.f32.mrf.mxu0 }
 0x269   :  { %v6684_v27 = vld [vmem:[#allocation31_spill] sm:$0xff] }
 0x26a   :  { %v784_v28 = vpop.f32.mrf.mxu0 }
 0x26b   :  { %v785_v46 = vadd.f32 %v784_v28, %v709_v25  ;;  %v6683_v25 = vld [vmem:[#allocation30_spill] sm:$0xff]  ;;  %v6685_v28 = vld [vmem:[#allocation32_spill] sm:$0xff] }
 0x26c   :  { %v4058_v30 = vpop.f32.mrf.mxu0 }
 0x26d   :  { %v6686_v30 = vld [vmem:[#allocation33_spill] sm:$0xff] }
 0x26e   :  { %v860_v31 = vpop.f32.mrf.mxu0 }
 0x26f   :  { %v864_v49 = vadd.f32 %v860_v31, %v785_v46  ;;  %v6687_v31 = vld [vmem:[#allocation34_spill] sm:$0xff]  ;;  %v6697_v46 = vld [vmem:[#allocation44_spill] sm:$0xff] }
 0x270   :  { %v4063_v33 = vpop.f32.mrf.mxu0 }
 0x271   :  { %v6688_v33 = vld [vmem:[#allocation35_spill] sm:$0xff] }
 0x272   :  { %v937_v34 = vpop.f32.mrf.mxu0 }
 0x273   :  { %v941_v50 = vadd.f32 %v937_v34, %v864_v49  ;;  %v6689_v34 = vld [vmem:[#allocation36_spill] sm:$0xff]  ;;  %v6700_v49 = vld [vmem:[#allocation47_spill] sm:$0xff] }
 0x274   :  { %v4068_v36 = vpop.f32.mrf.mxu0 }
 0x275   :  { %v6690_v36 = vld [vmem:[#allocation37_spill] sm:$0xff] }
 0x285   :  { %v1014_v37 = vpop.f32.mrf.mxu0 }
 0x286   :  { %v1018_v51 = vadd.f32 %v1014_v37, %v941_v50  ;;  %v6691_v37 = vld [vmem:[#allocation38_spill] sm:$0xff]  ;;  %v6701_v50 = vld [vmem:[#allocation48_spill] sm:$0xff] }
 0x287   :  { %v4073_v39 = vpop.f32.mrf.mxu0 }
 0x288   :  { %v1245_v40 = vpop.f32.mrf.mxu1  ;;  %v6692_v39 = vld [vmem:[#allocation39_spill] sm:$0xff] }
 0x289   :  { %v1091_v42 = vpop.f32.mrf.mxu0 }
 0x28a   :  { %v4088_v44 = vpop.f32.mrf.mxu1  ;;  %v1095_v52 = vadd.f32 %v1091_v42, %v1018_v51  ;;  %v6694_v42 = vld [vmem:[#allocation41_spill] sm:$0xff] }
 0x28b   :  { %v4078_v45 = vpop.f32.mrf.mxu0  ;;  %v6695_v44 = vld [vmem:[#allocation42_spill] sm:$0xff]  ;;  %v6702_v51 = vld [vmem:[#allocation49_spill] sm:$0xff] }
 0x28c   :  { %v6696_v45 = vld [vmem:[#allocation43_spill] sm:$0xff] }
 0x28d   :  { %v1168_v47 = vpop.f32.mrf.mxu0 }
 0x28e   :  { %v1172_v53 = vadd.f32 %v1168_v47, %v1095_v52  ;;  %v6698_v47 = vld [vmem:[#allocation45_spill] sm:$0xff]  ;;  %v6703_v52 = vld [vmem:[#allocation50_spill] sm:$0xff] }
 0x28f   :  { %v4083_v48 = vpop.f32.mrf.mxu0 }
 0x290   :  { %v1249_v54 = vadd.f32 %v1245_v40, %v1172_v53  ;;  %v6693_v40 = vld [vmem:[#allocation40_spill] sm:$0xff]  ;;  %v6699_v48 = vld [vmem:[#allocation46_spill] sm:$0xff]  ;;  %v6704_v53 = vld [vmem:[#allocation51_spill] sm:$0xff] }
 0x2a6   :  { %v1322_v55 = vpop.f32.mrf.mxu0 }
 0x2a7   :  { %v1326_v57 = vadd.f32 %v1322_v55, %v1249_v54  ;;  %v6705_v54 = vld [vmem:[#allocation52_spill] sm:$0xff]  ;;  %v6706_v55 = vld [vmem:[#allocation53_spill] sm:$0xff] }
 0x2a8   :  { %v4093_v58 = vpop.f32.mrf.mxu0 }
 0x2a9   :  { %v1333_v59 = vadd.f32 %v1331_v56, %v1326_v57  ;;  %v6707_v56 = vld [vmem:[#allocation54_spill] sm:$0xff]  ;;  %v6708_v57 = vld [vmem:[#allocation55_spill] sm:$0xff]  ;;  %v6709_v58 = vld [vmem:[#allocation56_spill] sm:$0xff] }
 0x2ab   :  { %v1335_v60 = vsel %vm1334_vm3, %v1333_v59, 0.0 }
 0x2ac   :  { %1336 = vadd.xlane.f32.xlu0 %v1335_v60  ;;  %v6711_v60 = vld [vmem:[#allocation58_spill] sm:$0xff] }
 0x335   :  { %v1337_v61 = vpop.xlane.xlu0 %1336 }
 0x336   :  { %v1339_v62 = vmul.f32 0.0078125, %v1337_v61  ;;  %v6712_v61 = vld [vmem:[#allocation59_spill] sm:$0xff] }
 0x338   :  { %v1340_v63 = vsub.f32 %v1333_v59, %v1339_v62  ;;  %v6710_v59 = vld [vmem:[#allocation57_spill] sm:$0xff]  ;;  %v6713_v62 = vld [vmem:[#allocation60_spill] sm:$0xff] }
 0x33a   :  { %v1341_v1 = vmul.f32 %v1340_v63, %v1340_v63 }
 0x33c   :  { %v1342_v2 = vsel %vm1334_vm3, %v1341_v1, 0.0  ;;  %v6715_v1 = vld [vmem:[#allocation62_spill] sm:$0xff] }
 0x33d   :  { %1343 = vadd.xlane.f32.xlu1 %v1342_v2  ;;  %v6716_v2 = vld [vmem:[#allocation63_spill] sm:$0xff] }
 0x3c6   :  { %v1344_v4 = vpop.xlane.xlu1 %1343 }
 0x3c7   :  { %v1345_v6 = vmul.f32 0.0078125, %v1344_v4  ;;  %v6718_v4 = vld [vmem:[#allocation65_spill] sm:$0xff] }
 0x3c9   :  { %v1346_v10 = vadd.f32 1e-05, %v1345_v6  ;;  %v6719_v6 = vld [vmem:[#allocation66_spill] sm:$0xff] }
 0x3cb   :  { %4315 = vrsqrt.f32 %v1346_v10  ;;  %v6720_v10 = vld [vmem:[#allocation67_spill] sm:$0xff] }
 0x3d8   :  { %v4316_v14 = vpop.eup %4315 }
 0x3d9   :  { %v1348_v20 = vmul.f32 %v4316_v14, %v5512_v38  ;;  %v6721_v14 = vld [vmem:[#allocation68_spill] sm:$0xff] }
 0x3db   :  { %1351 = vperm.xlu1 %4307, %v1348_v20   ;;  %v6722_v20 = vld [vmem:[#allocation69_spill] sm:$0xff] }
 0x3df   :  { %4308 = vset.pattern.permute.xlu1 %v4469_v35 }
 0x3e0   :  { %1356 = vperm.xlu1 %4308, %v5512_v38   ;;  %v6671_v38 = vld [vmem:[#allocation18_spill] sm:$0xff] }
 0x3e4   :  { %4309 = vset.pattern.permute.xlu1 %v6666_v43 }
 0x456   :  { %v1352_v29 = vpop.permute.xlu1 %1351 }
 0x457   :  { %v1354_v23 = vmul.f32 %v1352_v29, %v1340_v63  ;;  %v6714_v63 = vld [vmem:[#allocation61_spill] sm:$0xff]  ;;  %v6723_v29 = vld [vmem:[#allocation70_spill] sm:$0xff] }
 0x45b   :  { %v1357_v26 = vpop.permute.xlu1 %1356 }
 0x45c   :  { %v1359_v32 = vadd.f32 %v1357_v26, %v1354_v23  ;;  %v6724_v23 = vld [vmem:[#allocation71_spill] sm:$0xff]  ;;  %v6725_v26 = vld [vmem:[#allocation72_spill] sm:$0xff] }
 0x45e   :  { %v5643_v41 = vmax.f32 %v1359_v32, 0.0  ;;  %v6726_v32 = vld [vmem:[#allocation73_spill] sm:$0xff] }
 0x460   :  { %1426 = vmatmul.mubr.f32.vlgmr.msra.gmra.mxu1 %v5643_v41  ;;  %1497 = vmatmul.mubr.f32.vlgmr.msra.gmra.mxu0 %v5643_v41 }
 0x461   :  { %1504 = vmatpush1.msra.mxu1 %v6667_v0  ;;  %1575 = vmatpush1.msra.mxu0 %v6668_v5  ;;  %v6727_v0 = vld [vmem:[#allocation74_spill] sm:$0xff]  ;;  %v6728_v5 = vld [vmem:[#allocation75_spill] sm:$0xff] }
 0x462   :  { %1505 = vmatprep.subr.mxu1 %v6669_v7  ;;  %1576 = vmatprep.subr.mxu0 %v6670_v8  ;;  %v6729_v7 = vld [vmem:[#allocation76_spill] sm:$0xff]  ;;  %v6730_v8 = vld [vmem:[#allocation77_spill] sm:$0xff] }
 0x463   :  { %1506 = vmatpush1.msra.mxu1 %v6671_v38  ;;  %1577 = vmatpush1.msra.mxu0 %v6672_v9  ;;  %v6731_v38 = vld [vmem:[#allocation78_spill] sm:$0xff]  ;;  %v6732_v9 = vld [vmem:[#allocation79_spill] sm:$0xff] }
 0x464   :  { %1507 = vmatprep.subr.mxu1 %v6673_v11  ;;  %1578 = vmatprep.subr.mxu0 %v6674_v12  ;;  %v6733_v11 = vld [vmem:[#allocation80_spill] sm:$0xff]  ;;  %v6734_v12 = vld [vmem:[#allocation81_spill] sm:$0xff] }
 0x465   :  { %1508 = vmatpush1.msra.mxu1 %v6675_v13  ;;  %1579 = vmatpush1.msra.mxu0 %v6676_v15  ;;  %v6735_v13 = vld [vmem:[#allocation82_spill] sm:$0xff]  ;;  %v6736_v15 = vld [vmem:[#allocation83_spill] sm:$0xff] }
 0x466   :  { %1509 = vmatprep.subr.mxu1 %v6677_v16  ;;  %1580 = vmatprep.subr.mxu0 %v6678_v18  ;;  %v6737_v16 = vld [vmem:[#allocation84_spill] sm:$0xff]  ;;  %v6738_v18 = vld [vmem:[#allocation85_spill] sm:$0xff] }
 0x467   :  { %1510 = vmatpush1.msra.mxu1 %v6679_v19  ;;  %1581 = vmatpush1.msra.mxu0 %v6680_v21  ;;  %v6739_v19 = vld [vmem:[#allocation86_spill] sm:$0xff]  ;;  %v6740_v21 = vld [vmem:[#allocation87_spill] sm:$0xff] }
 0x468   :  { %1511 = vmatprep.subr.mxu1 %v6681_v22  ;;  %1582 = vmatprep.subr.mxu0 %v6682_v24  ;;  %v6741_v22 = vld [vmem:[#allocation88_spill] sm:$0xff]  ;;  %v6742_v24 = vld [vmem:[#allocation89_spill] sm:$0xff] }
 0x469   :  { %1512 = vmatpush1.msra.mxu1 %v6683_v25  ;;  %1583 = vmatpush1.msra.mxu0 %v6684_v27  ;;  %v6743_v25 = vld [vmem:[#allocation90_spill] sm:$0xff]  ;;  %v6744_v27 = vld [vmem:[#allocation91_spill] sm:$0xff] }
 0x46a   :  { %1513 = vmatprep.subr.mxu1 %v6685_v28  ;;  %1584 = vmatprep.subr.mxu0 %v6686_v30  ;;  %v5757_v28 = vld [vmem:[%s6460_s8] sm:$0xf] }
 0x46b   :  { %1514 = vmatpush1.msra.mxu1 %v6687_v31  ;;  %1585 = vmatpush1.msra.mxu0 %v6688_v33  ;;  %v1715_v30 = vld [vmem:[%s6461_s7] sm:$0xff] }
 0x46c   :  { %1515 = vmatprep.subr.mxu1 %v6689_v34  ;;  %1586 = vmatprep.subr.mxu0 %v6690_v36  ;;  %v1716_v36 = vld [vmem:[%s6461_s7 + $0x8] sm:$0xff] }
 0x46d   :  { %1516 = vmatpush1.msra.mxu1 %v6691_v37  ;;  %1587 = vmatpush1.msra.mxu0 %v6692_v39  ;;  %v1950_v39 = vrot.slane %v1716_v36, 4 }
 0x46e   :  { %1517 = vmatprep.subr.mxu1 %v6693_v40  ;;  %1588 = vmatprep.subr.mxu0 %v6694_v42  ;;  %v1717_v40 = vld [vmem:[%s6461_s7 + $0x10] sm:$0xff] }
 0x46f   :  { %1518 = vmatpush1.msra.mxu1 %v6695_v44  ;;  %1589 = vmatpush1.msra.mxu0 %v6696_v45  ;;  %v2104_v45 = vrot.slane %v1717_v40, 4 }
 0x470   :  { %1519 = vmatprep.subr.mxu1 %v6697_v46  ;;  %1590 = vmatprep.subr.mxu0 %v6698_v47  ;;  %v1718_v47 = vld [vmem:[%s6461_s7 + $0x18] sm:$0xff] }
 0x471   :  { %1520 = vmatpush1.msra.mxu1 %v6699_v48  ;;  %1591 = vmatpush1.msra.mxu0 %v6700_v49  ;;  %v2258_v49 = vrot.slane %v1718_v47, 4 }
 0x472   :  { %1521 = vmatprep.subr.mxu1 %v6701_v50  ;;  %1592 = vmatprep.subr.mxu0 %v6702_v51  ;;  %v1719_v50 = vld [vmem:[%s6461_s7 + $0x20] sm:$0xf] }
 0x473   :  { %1522 = vmatpush1.msra.mxu1 %v6703_v52  ;;  %1593 = vmatpush1.msra.mxu0 %v6704_v53  ;;  %v4321_v53 = vld [vmem:[%s6456_s3 + $0x440] sm:$0xff] }
 0x474   :  { %1523 = vmatprep.subr.mxu1 %v6705_v54  ;;  %1594 = vmatprep.subr.mxu0 %v6706_v55  ;;  %v4322_v54 = vld [vmem:[%s6456_s3 + $0x438] sm:$0xff] }
 0x475   :  { %1524 = vmatpush1.msra.mxu1 %v6707_v56  ;;  %1595 = vmatpush1.msra.mxu0 %v6708_v57  ;;  %v4323_v55 = vld [vmem:[%s6456_s3 + $0x3f8] sm:$0xff]  ;;  %v4324_v56 = vld [vmem:[%s6456_s3 + $0x3f0] sm:$0xff] }
 0x476   :  { %1525 = vmatprep.subr.mxu1 %v6709_v58  ;;  %1596 = vmatprep.subr.mxu0 %v6710_v59  ;;  %v4325_v57 = vld [vmem:[%s6456_s3 + $0x3b0] sm:$0xff]  ;;  %v4326_v58 = vld [vmem:[%s6456_s3 + $0x3a8] sm:$0xff] }
 0x477   :  { %1526 = vmatpush1.msra.mxu1 %v6711_v60  ;;  %1597 = vmatpush1.msra.mxu0 %v6712_v61  ;;  %v4327_v59 = vld [vmem:[%s6456_s3 + $0x368] sm:$0xff]  ;;  %v4328_v60 = vld [vmem:[%s6456_s3 + $0x360] sm:$0xff] }
 0x478   :  { %1527 = vmatprep.subr.mxu1 %v6713_v62  ;;  %1598 = vmatprep.subr.mxu0 %v6714_v63  ;;  %v4329_v61 = vld [vmem:[%s6456_s3 + $0x320] sm:$0xff]  ;;  %v4330_v62 = vld [vmem:[%s6456_s3 + $0x318] sm:$0xff] }
 0x479   :  { %1528 = vmatpush1.msra.mxu1 %v6715_v1  ;;  %1599 = vmatpush1.msra.mxu0 %v6716_v2  ;;  %v4331_v63 = vld [vmem:[%s6456_s3 + $0x2d8] sm:$0xff]  ;;  %v4332_v1 = vld [vmem:[%s6456_s3 + $0x2d0] sm:$0xff] }
 0x47a   :  { %1529 = vmatprep.subr.mxu1 %v6717_v3  ;;  %1600 = vmatprep.subr.mxu0 %v6718_v4  ;;  %v4333_v2 = vld [vmem:[%s6456_s3 + $0x290] sm:$0xff]  ;;  %v4334_v3 = vld [vmem:[%s6456_s3 + $0x288] sm:$0xff] }
 0x47b   :  { %1530 = vmatpush1.msra.mxu1 %v6719_v6  ;;  %1601 = vmatpush1.msra.mxu0 %v6720_v10  ;;  %v4335_v4 = vld [vmem:[%s6456_s3 + $0x248] sm:$0xff]  ;;  %v4336_v6 = vld [vmem:[%s6456_s3 + $0x240] sm:$0xff] }
 0x47c   :  { %1531 = vmatprep.subr.mxu1 %v6721_v14  ;;  %1602 = vmatprep.subr.mxu0 %v6722_v20  ;;  %v4337_v10 = vld [vmem:[%s6456_s3 + $0x200] sm:$0xff]  ;;  %v4338_v14 = vld [vmem:[%s6456_s3 + $0x1f8] sm:$0xff] }
 0x47d   :  { %1532 = vmatpush1.msra.mxu1 %v6723_v29  ;;  %1603 = vmatpush1.msra.mxu0 %v6724_v23  ;;  %v4339_v20 = vld [vmem:[%s6456_s3 + $0x1b8] sm:$0xff]  ;;  %v4340_v29 = vld [vmem:[%s6456_s3 + $0x1b0] sm:$0xff] }
 0x47e   :  { %1533 = vmatprep.subr.mxu1 %v6725_v26  ;;  %1604 = vmatprep.subr.mxu0 %v6726_v32  ;;  %v4341_v23 = vld [vmem:[%s6456_s3 + $0x170] sm:$0xff]  ;;  %v4342_v26 = vld [vmem:[%s6456_s3 + $0x168] sm:$0xff] }
 0x47f   :  { %1534 = vmatpush1.msra.mxu1 %v6727_v0  ;;  %1567 = vmatprep.mubr.f32.mxu1 %v6637_v17  ;;  %v4343_v32 = vld [vmem:[%s6456_s3 + $0x128] sm:$0xff]  ;;  %v4344_v0 = vld [vmem:[%s6456_s3 + $0x120] sm:$0xff] }
 0x480   :  { %1605 = vmatpush1.msra.mxu0 %v6728_v5  ;;  %1638 = vmatprep.mubr.f32.mxu0 %v6637_v17  ;;  %v4345_v5 = vld [vmem:[%s6456_s3 + $0xe0] sm:$0xff] }
 0x481   :  { %1568 = vmatmul.mubr.f32.vlgmr.msra.gmra.mxu1 %v5643_v41  ;;  %1639 = vmatmul.mubr.f32.vlgmr.msra.gmra.mxu0 %v5643_v41 }
 0x482   :  { %4094 = vmatprep.subr.mxu1 %v6637_v17  ;;  %4126 = vmatprep.mubr.msk.f32.mxu1 %vm4466_vm0, %v6637_v17 }
 0x483   :  { %4095 = vmatpush3.msra.mxu1 %v6729_v7  ;;  %4129 = vmatprep.subr.mxu0 %v6637_v17  ;;  %v4346_v7 = vld [vmem:[%s6456_s3 + $0xd8] sm:$0xff] }
 0x484   :  { %4096 = vmatprep.subr.mxu1 %v6637_v17  ;;  %4131 = vmatprep.mubr.msk.f32.mxu0 %vm4466_vm0, %v6637_v17 }
 0x485   :  { %4097 = vmatpush3.msra.mxu1 %v6730_v8  ;;  %2415 = vperm.xlu1 %4309, %v5757_v28   ;;  %v4347_v8 = vld [vmem:[%s6456_s3 + $0x98] sm:$0xff] }
 0x486   :  { %4098 = vmatprep.subr.mxu1 %v6637_v17 }
 0x487   :  { %4099 = vmatpush3.msra.mxu1 %v6731_v38  ;;  %v4348_v38 = vld [vmem:[%s6456_s3 + $0x90] sm:$0xff] }
 0x488   :  { %4100 = vmatprep.subr.mxu1 %v6637_v17 }
 0x489   :  { %4101 = vmatpush3.msra.mxu1 %v6732_v9  ;;  %4311 = vset.pattern.permute.xlu1 %v4469_v35  ;;  %v4349_v9 = vld [vmem:[%s6456_s3 + $0x50] sm:$0xff] }
 0x48a   :  { %4102 = vmatprep.subr.mxu1 %v6637_v17 }
 0x48b   :  { %4103 = vmatpush3.msra.mxu1 %v6733_v11  ;;  %v4350_v11 = vld [vmem:[%s6456_s3 + $0x48] sm:$0xff] }
 0x48c   :  { %4104 = vmatprep.subr.mxu1 %v6637_v17 }
 0x48d   :  { %4105 = vmatpush3.msra.mxu1 %v6734_v12  ;;  %v4351_v12 = vld [vmem:[%s6456_s3 + $0x8] sm:$0xff] }
 0x48e   :  { %4106 = vmatprep.subr.mxu1 %v6637_v17 }
 0x48f   :  { %4107 = vmatpush3.msra.mxu1 %v6735_v13  ;;  %v4352_v13 = vld [vmem:[%s6456_s3] sm:$0xff] }
 0x490   :  { %4108 = vmatprep.subr.mxu1 %v6637_v17 }
 0x491   :  { %4109 = vmatpush3.msra.mxu1 %v6736_v15  ;;  %v4353_v15 = vld [vmem:[%s6456_s3 + $0x460] sm:$0xff] }
 0x492   :  { %4110 = vmatprep.subr.mxu1 %v6637_v17 }
 0x493   :  { %4111 = vmatpush3.msra.mxu1 %v6737_v16 }
 0x494   :  { %4112 = vmatprep.subr.mxu1 %v6637_v17 }
 0x495   :  { %4113 = vmatpush3.msra.mxu1 %v6738_v18 }
 0x496   :  { %4114 = vmatprep.subr.mxu1 %v6637_v17 }
 0x497   :  { %4115 = vmatpush3.msra.mxu1 %v6739_v19 }
 0x498   :  { %4116 = vmatprep.subr.mxu1 %v6637_v17 }
 0x499   :  { %4117 = vmatpush3.msra.mxu1 %v6740_v21 }
 0x49a   :  { %4118 = vmatprep.subr.mxu1 %v6637_v17 }
 0x49b   :  { %4119 = vmatpush3.msra.mxu1 %v6741_v22 }
 0x49c   :  { %4120 = vmatprep.subr.mxu1 %v6637_v17 }
 0x49d   :  { %4121 = vmatpush3.msra.mxu1 %v6742_v24 }
 0x49e   :  { %4122 = vmatprep.subr.mxu1 %v6637_v17 }
 0x49f   :  { %4123 = vmatpush3.msra.mxu1 %v6743_v25 }
 0x4a0   :  { %4124 = vmatprep.subr.mxu1 %v6637_v17 }
 0x4a1   :  { %4125 = vmatpush3.msra.mxu1 %v6744_v27 }
 0x4a2   :  { %4127 = vmatmul.mubr.f32.vlgmr.msra.gmra.mxu1 %v5643_v41  ;;  %4169 = vmatprep.subr.mxu1 %v6637_v17  ;;  %v1721_v41 = vrot.slane %v1715_v30, 4 }
 0x4a3   :  { %4171 = vmatprep.mubr.msk.f32.mxu1 %vm4466_vm0, %v6637_v17 }
 0x520   :  { %v1427_v31 = vpop.f32.mrf.mxu1  ;;  %v1498_v34 = vpop.f32.mrf.mxu0 }
 0x522   :  { %v1429_v33 = vpop.f32.mrf.mxu1  ;;  %v1500_v37 = vpop.f32.mrf.mxu0 }
 0x523   :  { %4130 = vmatpush3.msk.msra.mxu0 %vm1334_vm3, %v1429_v33 }
 0x524   :  { %4132 = vmatmul.mubr.msk.f32.vlgmr.msra.gmra.mxu0 %vm1722_vm4, %v1721_v41  ;;  %4134 = vmatprep.subr.mxu0 %v6637_v17 }
 0x525   :  { %4135 = vmatpush3.msk.msra.mxu0 %vm1334_vm3, %v1427_v31  ;;  %4136 = vmatprep.mubr.msk.f32.mxu0 %vm4466_vm0, %v6637_v17 }
 0x526   :  { %4139 = vmatprep.subr.mxu0 %v6637_v17 }
 0x528   :  { %4137 = vmatmul.mubr.msk.f32.vlgmr.msra.gmra.mxu0 %vm1722_vm4, %v1715_v30 }
 0x529   :  { %4140 = vmatpush3.msk.msra.mxu0 %vm1334_vm3, %v1498_v34  ;;  %4141 = vmatprep.mubr.msk.f32.mxu0 %vm4466_vm0, %v6637_v17 }
 0x52a   :  { %4144 = vmatprep.subr.mxu0 %v6637_v17 }
 0x52c   :  { %4142 = vmatmul.mubr.msk.f32.vlgmr.msra.gmra.mxu0 %vm1722_vm4, %v1716_v36 }
 0x52d   :  { %4145 = vmatpush3.msk.msra.mxu0 %vm1334_vm3, %v1500_v37  ;;  %4146 = vmatprep.mubr.msk.f32.mxu0 %vm4466_vm0, %v6637_v17 }
 0x52e   :  { %4149 = vmatprep.subr.mxu0 %v6637_v17 }
 0x530   :  { %4147 = vmatmul.mubr.msk.f32.vlgmr.msra.gmra.mxu0 %vm1722_vm4, %v1950_v39 }
 0x531   :  { %4151 = vmatprep.mubr.msk.f32.mxu0 %vm4466_vm0, %v6637_v17 }
 0x541   :  { %v1569_v42 = vpop.f32.mrf.mxu1  ;;  %v1640_v46 = vpop.f32.mrf.mxu0 }
 0x542   :  { %4150 = vmatpush3.msk.msra.mxu0 %vm1334_vm3, %v1569_v42 }
 0x543   :  { %v1571_v44 = vpop.f32.mrf.mxu1  ;;  %4152 = vmatmul.mubr.msk.f32.vlgmr.msra.gmra.mxu0 %vm1722_vm4, %v1717_v40  ;;  %4154 = vmatprep.subr.mxu0 %v6637_v17  ;;  %v1642_v48 = vpop.f32.mrf.mxu0 }
 0x544   :  { %4155 = vmatpush3.msk.msra.mxu0 %vm1334_vm3, %v1571_v44  ;;  %4156 = vmatprep.mubr.msk.f32.mxu0 %vm4466_vm0, %v6637_v17 }
 0x545   :  { %4159 = vmatprep.subr.mxu0 %v6637_v17 }
 0x547   :  { %4157 = vmatmul.mubr.msk.f32.vlgmr.msra.gmra.mxu0 %vm1722_vm4, %v2104_v45 }
 0x548   :  { %4160 = vmatpush3.msk.msra.mxu0 %vm1334_vm3, %v1640_v46  ;;  %4161 = vmatprep.mubr.msk.f32.mxu0 %vm4466_vm0, %v6637_v17 }
 0x549   :  { %4164 = vmatprep.subr.mxu0 %v6637_v17 }
 0x54b   :  { %4162 = vmatmul.mubr.msk.f32.vlgmr.msra.gmra.mxu0 %vm1722_vm4, %v1718_v47 }
 0x54c   :  { %4165 = vmatpush3.msk.msra.mxu0 %vm1334_vm3, %v1642_v48  ;;  %4166 = vmatprep.mubr.msk.f32.mxu0 %vm4466_vm0, %v6637_v17 }
 0x54d   :  { %4174 = vmatprep.subr.mxu0 %v6637_v17 }
 0x54f   :  { %4167 = vmatmul.mubr.msk.f32.vlgmr.msra.gmra.mxu0 %vm1722_vm4, %v2258_v49 }
 0x550   :  { %4178 = vmatprep.mubr.msk.f32.mxu0 %vm4466_vm0, %v6637_v17 }
 0x562   :  { %v1711_v51 = vpop.f32.mrf.mxu1 }
 0x563   :  { %4170 = vmatpush3.msk.msra.mxu1 %vm1334_vm3, %v1711_v51 }
 0x564   :  { %v4128_v52 = vpop.f32.mrf.mxu1  ;;  %4172 = vmatmul.mubr.msk.f32.vlgmr.msra.gmra.mxu1 %vm1722_vm4, %v1719_v50  ;;  %2522 = vmatprep.subr.mxu1 %v4321_v53  ;;  %v2416_v50 = vpop.permute.xlu1 %2415 }
 0x565   :  { %2523 = vmatpush1.msra.mxu1 %v4322_v54  ;;  %2586 = vmatprep.mubr.f32.mxu1 %v6637_v17 }
 0x566   :  { %2524 = vmatprep.subr.mxu1 %v4323_v55  ;;  %v2446_v55 = vld [vmem:[%s6462_s4 + $0x8] sm:$0xff] }
 0x567   :  { %2525 = vmatpush1.msra.mxu1 %v4324_v56  ;;  %v2445_v56 = vld [vmem:[%s6462_s4] sm:$0xff]  ;;  %4175 = vmatpush3.msra.mxu0 %v2446_v55 }
 0x568   :  { %2526 = vmatprep.subr.mxu1 %v4325_v57  ;;  %v2444_v57 = vld [vmem:[%s6463_s1] sm:$0xf]  ;;  %4176 = vmatprep.subr.mxu0 %v6637_v17 }
 0x569   :  { %2527 = vmatpush1.msra.mxu1 %v4326_v58  ;;  %4177 = vmatpush3.msra.mxu0 %v2445_v56  ;;  %v4354_v58 = vld [vmem:[%s6456_s3 + $0x450] sm:$0xff]  ;;  %v4394_v55 = vld [vmem:[%s6456_s3 + $0x3e0] sm:$0xff]  ;;  %v4395_v56 = vld [vmem:[%s6456_s3 + $0x3c8] sm:$0xff] }
 0x56a   :  { %2528 = vmatprep.subr.mxu1 %v4327_v59  ;;  %4179 = vmatmul.mubr.msk.f32.vlgmr.msra.gmra.mxu0 %vm2447_vm5, %v2444_v57  ;;  %v4355_v59 = vld [vmem:[%s6456_s3 + $0x448] sm:$0xff]  ;;  %v4396_v57 = vld [vmem:[%s6456_s3 + $0x3d8] sm:$0xff] }
 0x56b   :  { %2529 = vmatpush1.msra.mxu1 %v4328_v60  ;;  %2593 = vmatprep.subr.mxu0 %v4354_v58  ;;  %v4356_v60 = vld [vmem:[%s6456_s3 + $0x408] sm:$0xff] }
 0x56c   :  { %2530 = vmatprep.subr.mxu1 %v4329_v61  ;;  %2594 = vmatpush1.msra.mxu0 %v4355_v59  ;;  %v4357_v61 = vld [vmem:[%s6456_s3 + $0x400] sm:$0xff]  ;;  %v4397_v58 = vld [vmem:[%s6456_s3 + $0x388] sm:$0xff]  ;;  %v4398_v59 = vld [vmem:[%s6456_s3 + $0x398] sm:$0xff] }
 0x56d   :  { %2531 = vmatpush1.msra.mxu1 %v4330_v62  ;;  %2657 = vmatprep.mubr.f32.mxu0 %v6637_v17  ;;  %v4358_v62 = vld [vmem:[%s6456_s3 + $0x3c0] sm:$0xff] }
 0x56e   :  { %2532 = vmatprep.subr.mxu1 %v4331_v63  ;;  %2595 = vmatprep.subr.mxu0 %v4356_v60  ;;  %v4359_v63 = vld [vmem:[%s6456_s3 + $0x3b8] sm:$0xff]  ;;  %v4399_v60 = vld [vmem:[%s6456_s3 + $0x380] sm:$0xff] }
 0x56f   :  { %2533 = vmatpush1.msra.mxu1 %v4332_v1  ;;  %2596 = vmatpush1.msra.mxu0 %v4357_v61  ;;  %v4360_v1 = vld [vmem:[%s6456_s3 + $0x378] sm:$0xff]  ;;  %v4400_v61 = vld [vmem:[%s6456_s3 + $0x390] sm:$0xff] }
 0x570   :  { %2534 = vmatprep.subr.mxu1 %v4333_v2  ;;  %2597 = vmatprep.subr.mxu0 %v4358_v62  ;;  %v4361_v2 = vld [vmem:[%s6456_s3 + $0x370] sm:$0xff]  ;;  %v4401_v62 = vld [vmem:[%s6456_s3 + $0x340] sm:$0xff] }
 0x571   :  { %2535 = vmatpush1.msra.mxu1 %v4334_v3  ;;  %2598 = vmatpush1.msra.mxu0 %v4359_v63  ;;  %v4362_v3 = vld [vmem:[%s6456_s3 + $0x330] sm:$0xff] }
 0x572   :  { %2536 = vmatprep.subr.mxu1 %v4335_v4  ;;  %2599 = vmatprep.subr.mxu0 %v4360_v1  ;;  %v4363_v4 = vld [vmem:[%s6456_s3 + $0x328] sm:$0xff]  ;;  %v4402_v63 = vld [vmem:[%s6456_s3 + $0x350] sm:$0xff]  ;;  %v4403_v1 = vld [vmem:[%s6456_s3 + $0x338] sm:$0xff] }
 0x573   :  { %2537 = vmatpush1.msra.mxu1 %v4336_v6  ;;  %2600 = vmatpush1.msra.mxu0 %v4361_v2  ;;  %v4364_v6 = vld [vmem:[%s6456_s3 + $0x2e8] sm:$0xff] }
 0x574   :  { %2538 = vmatprep.subr.mxu1 %v4337_v10  ;;  %2601 = vmatprep.subr.mxu0 %v4362_v3  ;;  %v4365_v10 = vld [vmem:[%s6456_s3 + $0x2e0] sm:$0xff]  ;;  %v4404_v2 = vld [vmem:[%s6456_s3 + $0x348] sm:$0xff]  ;;  %v4405_v3 = vld [vmem:[%s6456_s3 + $0x2f8] sm:$0xff] }
 0x575   :  { %2539 = vmatpush1.msra.mxu1 %v4338_v14  ;;  %2602 = vmatpush1.msra.mxu0 %v4363_v4  ;;  %v4366_v14 = vld [vmem:[%s6456_s3 + $0x2a0] sm:$0xff]  ;;  %v4406_v4 = vld [vmem:[%s6456_s3 + $0x308] sm:$0xff] }
 0x576   :  { %2540 = vmatprep.subr.mxu1 %v4339_v20  ;;  %2603 = vmatprep.subr.mxu0 %v4364_v6  ;;  %v4367_v20 = vld [vmem:[%s6456_s3 + $0x298] sm:$0xff]  ;;  %v4407_v6 = vld [vmem:[%s6456_s3 + $0x2f0] sm:$0xff] }
 0x577   :  { %2541 = vmatpush1.msra.mxu1 %v4340_v29  ;;  %2604 = vmatpush1.msra.mxu0 %v4365_v10  ;;  %v4368_v29 = vld [vmem:[%s6456_s3 + $0x258] sm:$0xff]  ;;  %v4408_v10 = vld [vmem:[%s6456_s3 + $0x300] sm:$0xff] }
 0x578   :  { %2542 = vmatprep.subr.mxu1 %v4341_v23  ;;  %2605 = vmatprep.subr.mxu0 %v4366_v14  ;;  %v4369_v23 = vld [vmem:[%s6456_s3 + $0x250] sm:$0xff] }
 0x579   :  { %2543 = vmatpush1.msra.mxu1 %v4342_v26  ;;  %2606 = vmatpush1.msra.mxu0 %v4367_v20  ;;  %v4370_v26 = vld [vmem:[%s6456_s3 + $0x210] sm:$0xff]  ;;  %v4410_v20 = vld [vmem:[%s6456_s3 + $0x2c0] sm:$0xff] }
 0x57a   :  { %2544 = vmatprep.subr.mxu1 %v4343_v32  ;;  %2607 = vmatprep.subr.mxu0 %v4368_v29  ;;  %v4371_v32 = vld [vmem:[%s6456_s3 + $0x208] sm:$0xff]  ;;  %v4409_v14 = vld [vmem:[%s6456_s3 + $0x2b0] sm:$0xff] }
 0x57b   :  { %2545 = vmatpush1.msra.mxu1 %v4344_v0  ;;  %2608 = vmatpush1.msra.mxu0 %v4369_v23  ;;  %v4372_v0 = vld [vmem:[%s6456_s3 + $0x1c8] sm:$0xff]  ;;  %v4412_v23 = vld [vmem:[%s6456_s3 + $0x2b8] sm:$0xff] }
 0x57c   :  { %2546 = vmatprep.subr.mxu1 %v4345_v5  ;;  %2609 = vmatprep.subr.mxu0 %v4370_v26  ;;  %v4373_v5 = vld [vmem:[%s6456_s3 + $0x1c0] sm:$0xff]  ;;  %v4411_v29 = vld [vmem:[%s6456_s3 + $0x2a8] sm:$0xff] }
 0x57d   :  { %2547 = vmatpush1.msra.mxu1 %v4346_v7  ;;  %2610 = vmatpush1.msra.mxu0 %v4371_v32  ;;  %v4374_v7 = vld [vmem:[%s6456_s3 + $0x180] sm:$0xff]  ;;  %v4413_v26 = vld [vmem:[%s6456_s3 + $0x268] sm:$0xff]  ;;  %v4414_v32 = vld [vmem:[%s6456_s3 + $0x278] sm:$0xff] }
 0x57e   :  { %2548 = vmatprep.subr.mxu1 %v4347_v8  ;;  %2611 = vmatprep.subr.mxu0 %v4372_v0  ;;  %v4375_v8 = vld [vmem:[%s6456_s3 + $0x178] sm:$0xff]  ;;  %v4415_v0 = vld [vmem:[%s6456_s3 + $0x260] sm:$0xff] }
 0x57f   :  { %2549 = vmatpush1.msra.mxu1 %v4348_v38  ;;  %2612 = vmatpush1.msra.mxu0 %v4373_v5  ;;  %v4376_v38 = vld [vmem:[%s6456_s3 + $0x138] sm:$0xff]  ;;  %v4416_v5 = vld [vmem:[%s6456_s3 + $0x270] sm:$0xff] }
 0x580   :  { %2550 = vmatprep.subr.mxu1 %v4349_v9  ;;  %2613 = vmatprep.subr.mxu0 %v4374_v7  ;;  %v4377_v9 = vld [vmem:[%s6456_s3 + $0x130] sm:$0xff]  ;;  %v4417_v7 = vld [vmem:[%s6456_s3 + $0x220] sm:$0xff] }
 0x581   :  { %2551 = vmatpush1.msra.mxu1 %v4350_v11  ;;  %2614 = vmatpush1.msra.mxu0 %v4375_v8  ;;  %v4378_v11 = vld [vmem:[%s6456_s3 + $0xf0] sm:$0xff] }
 0x582   :  { %2552 = vmatprep.subr.mxu1 %v4351_v12  ;;  %2615 = vmatprep.subr.mxu0 %v4376_v38  ;;  %v4379_v12 = vld [vmem:[%s6456_s3 + $0xe8] sm:$0xff]  ;;  %v4418_v8 = vld [vmem:[%s6456_s3 + $0x230] sm:$0xff]  ;;  %v4419_v38 = vld [vmem:[%s6456_s3 + $0x218] sm:$0xff] }
 0x583   :  { %2553 = vmatpush1.msra.mxu1 %v4352_v13  ;;  %2616 = vmatpush1.msra.mxu0 %v4377_v9  ;;  %v4380_v13 = vld [vmem:[%s6456_s3 + $0xa8] sm:$0xff] }
 0x584   :  { %2664 = vmatprep.subr.mxu1 %v4353_v15  ;;  %2617 = vmatprep.subr.mxu0 %v4378_v11  ;;  %v4381_v15 = vld [vmem:[%s6456_s3 + $0xa0] sm:$0xff]  ;;  %v4420_v9 = vld [vmem:[%s6456_s3 + $0x228] sm:$0xff]  ;;  %v4421_v11 = vld [vmem:[%s6456_s3 + $0x1d8] sm:$0xff] }
 0x585   :  { %2618 = vmatpush1.msra.mxu0 %v4379_v12  ;;  %v4422_v12 = vld [vmem:[%s6456_s3 + $0x1e8] sm:$0xff] }
 0x586   :  { %2619 = vmatprep.subr.mxu0 %v4380_v13  ;;  %v4423_v13 = vld [vmem:[%s6456_s3 + $0x1d0] sm:$0xff] }
 0x587   :  { %2620 = vmatpush1.msra.mxu0 %v4381_v15  ;;  %v4424_v15 = vld [vmem:[%s6456_s3 + $0x1e0] sm:$0xff] }
 0x5e4   :  { %v1794_v16 = vpop.f32.mrf.mxu0 }
 0x5e6   :  { %v4133_v18 = vpop.f32.mrf.mxu0 }
 0x5e7   :  { %v4383_v18 = vld [vmem:[%s6456_s3 + $0x58] sm:$0xff] }
 0x5e8   :  { %v1869_v19 = vpop.f32.mrf.mxu0 }
 0x5e9   :  { %v1870_v34 = vadd.f32 %v1869_v19, %v1794_v16  ;;  %v4382_v16 = vld [vmem:[%s6456_s3 + $0x60] sm:$0xff]  ;;  %v4384_v19 = vld [vmem:[%s6456_s3 + $0x18] sm:$0xff] }
 0x5ea   :  { %v4138_v21 = vpop.f32.mrf.mxu0  ;;  %2621 = vmatprep.subr.mxu0 %v4382_v16  ;;  %v4425_v16 = vld [vmem:[%s6456_s3 + $0x190] sm:$0xff] }
 0x5eb   :  { %2622 = vmatpush1.msra.mxu0 %v4383_v18  ;;  %v4385_v21 = vld [vmem:[%s6456_s3 + $0x10] sm:$0xff]  ;;  %v4426_v18 = vld [vmem:[%s6456_s3 + $0x1a0] sm:$0xff] }
 0x5ec   :  { %v1945_v22 = vpop.f32.mrf.mxu0  ;;  %2623 = vmatprep.subr.mxu0 %v4384_v19  ;;  %v4427_v19 = vld [vmem:[%s6456_s3 + $0x188] sm:$0xff] }
 0x5ed   :  { %v1949_v39 = vadd.f32 %v1945_v22, %v1870_v34  ;;  %2624 = vmatpush1.msra.mxu0 %v4385_v21  ;;  %v4386_v22 = vld [vmem:[%s6456_s3 + $0x470] sm:$0xff]  ;;  %v4428_v21 = vld [vmem:[%s6456_s3 + $0x198] sm:$0xff] }
 0x5ee   :  { %v4143_v24 = vpop.f32.mrf.mxu0  ;;  %2735 = vmatprep.subr.mxu0 %v4386_v22  ;;  %v4429_v22 = vld [vmem:[%s6456_s3 + $0x148] sm:$0xff] }
 0x5f0   :  { %v2022_v25 = vpop.f32.mrf.mxu0 }
 0x5f1   :  { %v2026_v44 = vadd.f32 %v2022_v25, %v1949_v39 }
 0x5f2   :  { %v4148_v27 = vpop.f32.mrf.mxu0 }
 0x603   :  { %v2099_v30 = vpop.f32.mrf.mxu0 }
 0x604   :  { %v2103_v45 = vadd.f32 %v2099_v30, %v2026_v44 }
 0x605   :  { %v4153_v31 = vpop.f32.mrf.mxu0 }
 0x607   :  { %v2176_v41 = vpop.f32.mrf.mxu0 }
 0x608   :  { %v2180_v46 = vadd.f32 %v2176_v41, %v2103_v45 }
 0x609   :  { %v4158_v33 = vpop.f32.mrf.mxu0 }
 0x60b   :  { %v2253_v36 = vpop.f32.mrf.mxu0 }
 0x60c   :  { %v2257_v47 = vadd.f32 %v2253_v36, %v2180_v46 }
 0x60d   :  { %v4163_v37 = vpop.f32.mrf.mxu0 }
 0x60f   :  { %v2330_v40 = vpop.f32.mrf.mxu0 }
 0x610   :  { %v2334_v48 = vadd.f32 %v2330_v40, %v2257_v47 }
 0x611   :  { %v4168_v42 = vpop.f32.mrf.mxu0 }
 0x624   :  { %v2407_v49 = vpop.f32.mrf.mxu1 }
 0x625   :  { %v2411_v51 = vadd.f32 %v2407_v49, %v2334_v48  ;;  %v4387_v49 = vld [vmem:[%s6456_s3 + $0x458] sm:$0xff] }
 0x626   :  { %v4173_v52 = vpop.f32.mrf.mxu1 }
 0x627   :  { %v5918_v53 = vadd.f32 %v2416_v50, %v2411_v51  ;;  %v4389_v50 = vld [vmem:[%s6456_s3 + $0x418] sm:$0xff]  ;;  %v4390_v51 = vld [vmem:[%s6456_s3 + $0x428] sm:$0xff]  ;;  %v4391_v52 = vld [vmem:[%s6456_s3 + $0x410] sm:$0xff] }
 0x629   :  { %v2419_v54 = vsel %vm1334_vm3, %v5918_v53, 0.0 }
 0x62a   :  { %2420 = vadd.xlane.f32.xlu1 %v2419_v54  ;;  %v2517_v39 = vpop.f32.mrf.mxu0  ;;  %v4393_v54 = vld [vmem:[%s6456_s3 + $0x3d0] sm:$0xff] }
 0x62c   :  { %v4180_v40 = vpop.f32.mrf.mxu0 }
 0x62d   :  { %v4441_v40 = vld [vmem:[%s6456_s3 + $0x70] sm:$0xff] }
 0x63b   :  { %2439 = vperm.xlu1 %4311, %v5757_v28  }
 0x63f   :  { %4312 = vset.pattern.permute.xlu1 %v6666_v43 }
 0x6b3   :  { %v2421_v24 = vpop.xlane.xlu1 %2420 }
 0x6b4   :  { %v2422_v25 = vmul.f32 0.0078125, %v2421_v24  ;;  %v4430_v24 = vld [vmem:[%s6456_s3 + $0x158] sm:$0xff] }
 0x6b6   :  { %v2423_v27 = vsub.f32 %v5918_v53, %v2422_v25  ;;  %v4392_v53 = vld [vmem:[%s6456_s3 + $0x420] sm:$0xff] }
 0x6b7   :  { %v2440_v44 = vpop.permute.xlu1 %2439  ;;  %v4431_v25 = vld [vmem:[%s6456_s3 + $0x140] sm:$0xff] }
 0x6b8   :  { %v2424_v30 = vmul.f32 %v2423_v27, %v2423_v27 }
 0x6ba   :  { %v2425_v31 = vsel %vm1334_vm3, %v2424_v30, 0.0  ;;  %v4433_v30 = vld [vmem:[%s6456_s3 + $0x100] sm:$0xff] }
 0x6bb   :  { %2426 = vadd.xlane.f32.xlu0 %v2425_v31  ;;  %v4434_v31 = vld [vmem:[%s6456_s3 + $0x110] sm:$0xff] }
 0x744   :  { %v2427_v41 = vpop.xlane.xlu0 %2426 }
 0x745   :  { %v2428_v33 = vmul.f32 0.0078125, %v2427_v41  ;;  %v4435_v41 = vld [vmem:[%s6456_s3 + $0xf8] sm:$0xff] }
 0x747   :  { %v2429_v34 = vadd.f32 1e-05, %v2428_v33  ;;  %v4436_v33 = vld [vmem:[%s6456_s3 + $0x108] sm:$0xff] }
 0x749   :  { %4317 = vrsqrt.f32 %v2429_v34  ;;  %v4437_v34 = vld [vmem:[%s6456_s3 + $0xb8] sm:$0xff] }
 0x756   :  { %v4318_v36 = vpop.eup %4317 }
 0x757   :  { %v2431_v37 = vmul.f32 %v4318_v36, %v5757_v28  ;;  %v4388_v28 = vld [vmem:[%s6456_s3 + $0x468] sm:$0xff] }
 0x758   :  { %v4438_v36 = vld [vmem:[%s6456_s3 + $0xc8] sm:$0xff] }
 0x759   :  { %2434 = vperm.xlu0 %4310, %v2431_v37   ;;  %v4439_v37 = vld [vmem:[%s6456_s3 + $0xb0] sm:$0xff] }
 0x7d4   :  { %v2435_v42 = vpop.permute.xlu0 %2434 }
 0x7d5   :  { %v2437_v45 = vmul.f32 %v2435_v42, %v2423_v27  ;;  %v4432_v27 = vld [vmem:[%s6456_s3 + $0x150] sm:$0xff]  ;;  %v4442_v42 = vld [vmem:[%s6456_s3 + $0x80] sm:$0xff] }
 0x7d7   :  { %v2442_v46 = vadd.f32 %v2440_v44, %v2437_v45  ;;  %v4443_v44 = vld [vmem:[%s6456_s3 + $0x68] sm:$0xff]  ;;  %v4444_v45 = vld [vmem:[%s6456_s3 + $0x78] sm:$0xff] }
 0x7d9   :  { %v2443_v47 = vmax.f32 %v2442_v46, 0.0  ;;  %v4445_v46 = vld [vmem:[%s6456_s3 + $0x28] sm:$0xff] }
 0x7db   :  { %v6037_v48 = vadd.f32 %v2517_v39, %v2443_v47  ;;  %v4440_v39 = vld [vmem:[%s6456_s3 + $0xc0] sm:$0xff]  ;;  %v4446_v47 = vld [vmem:[%s6456_s3 + $0x38] sm:$0xff] }
 0x7dd   :  { %2587 = vmatmul.mubr.f32.vlgmr.msra.gmra.mxu1 %v6037_v48  ;;  %2658 = vmatmul.mubr.f32.vlgmr.msra.gmra.mxu0 %v6037_v48 }
 0x7de   :  { %2665 = vmatpush1.msra.mxu1 %v4387_v49  ;;  %2736 = vmatpush1.msra.mxu0 %v4388_v28  ;;  %v4447_v49 = vld [vmem:[%s6456_s3 + $0x20] sm:$0xff]  ;;  %v4448_v28 = vld [vmem:[%s6456_s3 + $0x30] sm:$0xff] }
 0x7df   :  { %2666 = vmatprep.subr.mxu1 %v4389_v50  ;;  %2737 = vmatprep.subr.mxu0 %v4390_v51  ;;  %v4449_v50 = vld [vmem:[%s6456_s3 + $0x478] sm:$0xff]  ;;  %v4450_v51 = vld [vmem:[%s6456_s3 + $0x430] sm:$0xff] }
 0x7e0   :  { %2667 = vmatpush1.msra.mxu1 %v4391_v52  ;;  %2738 = vmatpush1.msra.mxu0 %v4392_v53  ;;  %v4451_v52 = vld [vmem:[%s6456_s3 + $0x3e8] sm:$0xff]  ;;  %v4452_v53 = vld [vmem:[%s6456_s3 + $0x3a0] sm:$0xff] }
 0x7e1   :  { %2668 = vmatprep.subr.mxu1 %v4393_v54  ;;  %2739 = vmatprep.subr.mxu0 %v4394_v55  ;;  %v4453_v54 = vld [vmem:[%s6456_s3 + $0x358] sm:$0xff]  ;;  %v4454_v55 = vld [vmem:[%s6456_s3 + $0x310] sm:$0xff] }
 0x7e2   :  { %2669 = vmatpush1.msra.mxu1 %v4395_v56  ;;  %2740 = vmatpush1.msra.mxu0 %v4396_v57  ;;  %v4455_v56 = vld [vmem:[%s6456_s3 + $0x2c8] sm:$0xff]  ;;  %v4456_v57 = vld [vmem:[%s6456_s3 + $0x280] sm:$0xff] }
 0x7e3   :  { %2670 = vmatprep.subr.mxu1 %v4397_v58  ;;  %2741 = vmatprep.subr.mxu0 %v4398_v59  ;;  %v4457_v58 = vld [vmem:[%s6456_s3 + $0x238] sm:$0xff]  ;;  %v4458_v59 = vld [vmem:[%s6456_s3 + $0x1f0] sm:$0xff] }
 0x7e4   :  { %2671 = vmatpush1.msra.mxu1 %v4399_v60  ;;  %2742 = vmatpush1.msra.mxu0 %v4400_v61  ;;  %v4459_v60 = vld [vmem:[%s6456_s3 + $0x1a8] sm:$0xff]  ;;  %v4460_v61 = vld [vmem:[%s6456_s3 + $0x160] sm:$0xff] }
 0x7e5   :  { %2672 = vmatprep.subr.mxu1 %v4401_v62  ;;  %2743 = vmatprep.subr.mxu0 %v4402_v63  ;;  %v4461_v62 = vld [vmem:[%s6456_s3 + $0x118] sm:$0xff]  ;;  %v4462_v63 = vld [vmem:[%s6456_s3 + $0xd0] sm:$0xff] }
 0x7e6   :  { %2673 = vmatpush1.msra.mxu1 %v4403_v1  ;;  %2744 = vmatpush1.msra.mxu0 %v4404_v2  ;;  %v4463_v1 = vld [vmem:[%s6456_s3 + $0x88] sm:$0xff]  ;;  %v4464_v2 = vld [vmem:[%s6456_s3 + $0x40] sm:$0xff] }
 0x7e7   :  { %2674 = vmatprep.subr.mxu1 %v4405_v3  ;;  %2745 = vmatprep.subr.mxu0 %v4406_v4  ;;  %v6307_v3 = vld [vmem:[%s6464_s10] sm:$0xf] }
 0x7e8   :  { %2675 = vmatpush1.msra.mxu1 %v4407_v6  ;;  %2746 = vmatpush1.msra.mxu0 %v4408_v10  ;;  %v2876_v4 = vld [vmem:[%s6465_s9] sm:$0xff] }
 0x7e9   :  { %2676 = vmatprep.subr.mxu1 %v4409_v14  ;;  %2747 = vmatprep.subr.mxu0 %v4410_v20  ;;  %v2877_v14 = vld [vmem:[%s6465_s9 + $0x8] sm:$0xff] }
 0x7ea   :  { %2677 = vmatpush1.msra.mxu1 %v4411_v29  ;;  %2748 = vmatpush1.msra.mxu0 %v4412_v23  ;;  %v3110_v29 = vrot.slane %v2877_v14, 4  ;;  %v2878_v23 = vld [vmem:[%s6465_s9 + $0x10] sm:$0xff] }
 0x7eb   :  { %2678 = vmatprep.subr.mxu1 %v4413_v26  ;;  %2749 = vmatprep.subr.mxu0 %v4414_v32 }
 0x7ec   :  { %2679 = vmatpush1.msra.mxu1 %v4415_v0  ;;  %2750 = vmatpush1.msra.mxu0 %v4416_v5  ;;  %v3264_v0 = vrot.slane %v2878_v23, 4 }
 0x7ed   :  { %2680 = vmatprep.subr.mxu1 %v4417_v7  ;;  %2751 = vmatprep.subr.mxu0 %v4418_v8  ;;  %v2879_v7 = vld [vmem:[%s6465_s9 + $0x18] sm:$0xff] }
 0x7ee   :  { %2681 = vmatpush1.msra.mxu1 %v4419_v38  ;;  %2752 = vmatpush1.msra.mxu0 %v4420_v9  ;;  %v3418_v38 = vrot.slane %v2879_v7, 4  ;;  %v2880_v9 = vld [vmem:[%s6465_s9 + $0x20] sm:$0xf] }
 0x7ef   :  { %2682 = vmatprep.subr.mxu1 %v4421_v11  ;;  %2753 = vmatprep.subr.mxu0 %v4422_v12 }
 0x7f0   :  { %2683 = vmatpush1.msra.mxu1 %v4423_v13  ;;  %2754 = vmatpush1.msra.mxu0 %v4424_v15 }
 0x7f1   :  { %2684 = vmatprep.subr.mxu1 %v4425_v16  ;;  %2755 = vmatprep.subr.mxu0 %v4426_v18 }
 0x7f2   :  { %2685 = vmatpush1.msra.mxu1 %v4427_v19  ;;  %2756 = vmatpush1.msra.mxu0 %v4428_v21 }
 0x7f3   :  { %2686 = vmatprep.subr.mxu1 %v4429_v22  ;;  %2757 = vmatprep.subr.mxu0 %v4430_v24 }
 0x7f4   :  { %2687 = vmatpush1.msra.mxu1 %v4431_v25  ;;  %2758 = vmatpush1.msra.mxu0 %v4432_v27 }
 0x7f5   :  { %2688 = vmatprep.subr.mxu1 %v4433_v30  ;;  %2759 = vmatprep.subr.mxu0 %v4434_v31 }
 0x7f6   :  { %2689 = vmatpush1.msra.mxu1 %v4435_v41  ;;  %2760 = vmatpush1.msra.mxu0 %v4436_v33 }
 0x7f7   :  { %2690 = vmatprep.subr.mxu1 %v4437_v34  ;;  %2761 = vmatprep.subr.mxu0 %v4438_v36 }
 0x7f8   :  { %2691 = vmatpush1.msra.mxu1 %v4439_v37  ;;  %2762 = vmatpush1.msra.mxu0 %v4440_v39 }
 0x7f9   :  { %2692 = vmatprep.subr.mxu1 %v4441_v40  ;;  %2763 = vmatprep.subr.mxu0 %v4442_v42 }
 0x7fa   :  { %2693 = vmatpush1.msra.mxu1 %v4443_v44  ;;  %2764 = vmatpush1.msra.mxu0 %v4444_v45 }
 0x7fb   :  { %2694 = vmatprep.subr.mxu1 %v4445_v46  ;;  %2765 = vmatprep.subr.mxu0 %v4446_v47 }
 0x7fc   :  { %2695 = vmatpush1.msra.mxu1 %v4447_v49  ;;  %2728 = vmatprep.mubr.f32.mxu1 %v6637_v17 }
 0x7fd   :  { %2766 = vmatpush1.msra.mxu0 %v4448_v28  ;;  %2799 = vmatprep.mubr.f32.mxu0 %v6637_v17 }
 0x7fe   :  { %2729 = vmatmul.mubr.f32.vlgmr.msra.gmra.mxu1 %v6037_v48  ;;  %2800 = vmatmul.mubr.f32.vlgmr.msra.gmra.mxu0 %v6037_v48 }
 0x7ff   :  { %4181 = vmatprep.subr.mxu1 %v6637_v17  ;;  %4213 = vmatprep.mubr.msk.f32.mxu1 %vm4466_vm0, %v6637_v17 }
 0x800   :  { %4182 = vmatpush3.msra.mxu1 %v4449_v50  ;;  %4216 = vmatprep.subr.mxu0 %v6637_v17 }
 0x801   :  { %4183 = vmatprep.subr.mxu1 %v6637_v17  ;;  %4218 = vmatprep.mubr.msk.f32.mxu0 %vm4466_vm0, %v6637_v17 }
 0x802   :  { %4184 = vmatpush3.msra.mxu1 %v4450_v51  ;;  %3575 = vperm.xlu1 %4312, %v6307_v3  }
 0x803   :  { %4185 = vmatprep.subr.mxu1 %v6637_v17 }
 0x804   :  { %4186 = vmatpush3.msra.mxu1 %v4451_v52 }
 0x805   :  { %4187 = vmatprep.subr.mxu1 %v6637_v17 }
 0x806   :  { %4188 = vmatpush3.msra.mxu1 %v4452_v53  ;;  %4313 = vset.pattern.permute.xlu1 %v4469_v35 }
 0x807   :  { %4189 = vmatprep.subr.mxu1 %v6637_v17 }
 0x808   :  { %4190 = vmatpush3.msra.mxu1 %v4453_v54 }
 0x809   :  { %4191 = vmatprep.subr.mxu1 %v6637_v17 }
 0x80a   :  { %4192 = vmatpush3.msra.mxu1 %v4454_v55 }
 0x80b   :  { %4193 = vmatprep.subr.mxu1 %v6637_v17 }
 0x80c   :  { %4194 = vmatpush3.msra.mxu1 %v4455_v56 }
 0x80d   :  { %4195 = vmatprep.subr.mxu1 %v6637_v17 }
 0x80e   :  { %4196 = vmatpush3.msra.mxu1 %v4456_v57 }
 0x80f   :  { %4197 = vmatprep.subr.mxu1 %v6637_v17 }
 0x810   :  { %4198 = vmatpush3.msra.mxu1 %v4457_v58 }
 0x811   :  { %4199 = vmatprep.subr.mxu1 %v6637_v17 }
 0x812   :  { %4200 = vmatpush3.msra.mxu1 %v4458_v59 }
 0x813   :  { %4201 = vmatprep.subr.mxu1 %v6637_v17 }
 0x814   :  { %4202 = vmatpush3.msra.mxu1 %v4459_v60 }
 0x815   :  { %4203 = vmatprep.subr.mxu1 %v6637_v17 }
 0x816   :  { %4204 = vmatpush3.msra.mxu1 %v4460_v61 }
 0x817   :  { %4205 = vmatprep.subr.mxu1 %v6637_v17 }
 0x818   :  { %4206 = vmatpush3.msra.mxu1 %v4461_v62 }
 0x819   :  { %4207 = vmatprep.subr.mxu1 %v6637_v17 }
 0x81a   :  { %4208 = vmatpush3.msra.mxu1 %v4462_v63  ;;  %v3702_v63 = vld [vmem:[%s6455_s2 + $0xf8] sm:$0xff] }
 0x81b   :  { %4209 = vmatprep.subr.mxu1 %v6637_v17 }
 0x81c   :  { %4210 = vmatpush3.msra.mxu1 %v4463_v1  ;;  %v3701_v1 = vld [vmem:[%s6455_s2 + $0xf0] sm:$0xff] }
 0x81d   :  { %4211 = vmatprep.subr.mxu1 %v6637_v17 }
 0x81e   :  { %4212 = vmatpush3.msra.mxu1 %v4464_v2  ;;  %v3605_v2 = vld [vmem:[%s6466_s12] sm:$0x7] }
 0x81f   :  { %4214 = vmatmul.mubr.f32.vlgmr.msra.gmra.mxu1 %v6037_v48  ;;  %4256 = vmatprep.subr.mxu1 %v6637_v17  ;;  %v2882_v48 = vrot.slane %v2876_v4, 4 }
 0x820   :  { %4258 = vmatprep.mubr.msk.f32.mxu1 %vm4466_vm0, %v6637_v17 }
 0x87d   :  { %v3576_v49 = vpop.permute.xlu1 %3575 }
 0x89d   :  { %v2588_v6 = vpop.f32.mrf.mxu1  ;;  %v2659_v35 = vpop.f32.mrf.mxu0 }
 0x89f   :  { %v2590_v10 = vpop.f32.mrf.mxu1  ;;  %v2661_v20 = vpop.f32.mrf.mxu0 }
 0x8a0   :  { %4217 = vmatpush3.msk.msra.mxu0 %vm1334_vm3, %v2590_v10  ;;  %v3695_v10 = vld [vmem:[%s6455_s2 + $0xc0] sm:$0xff] }
 0x8a1   :  { %4219 = vmatmul.mubr.msk.f32.vlgmr.msra.gmra.mxu0 %vm1722_vm4, %v2882_v48  ;;  %4221 = vmatprep.subr.mxu0 %v6637_v17  ;;  %v3696_v48 = vld [vmem:[%s6455_s2 + $0xc8] sm:$0xff] }
 0x8a2   :  { %4222 = vmatpush3.msk.msra.mxu0 %vm1334_vm3, %v2588_v6  ;;  %4223 = vmatprep.mubr.msk.f32.mxu0 %vm4466_vm0, %v6637_v17  ;;  %v3697_v6 = vld [vmem:[%s6455_s2 + $0xd0] sm:$0xff] }
 0x8a3   :  { %4226 = vmatprep.subr.mxu0 %v6637_v17 }
 0x8a5   :  { %4224 = vmatmul.mubr.msk.f32.vlgmr.msra.gmra.mxu0 %vm1722_vm4, %v2876_v4  ;;  %v3699_v4 = vld [vmem:[%s6455_s2 + $0xe0] sm:$0xff] }
 0x8a6   :  { %4227 = vmatpush3.msk.msra.mxu0 %vm1334_vm3, %v2659_v35  ;;  %4228 = vmatprep.mubr.msk.f32.mxu0 %vm4466_vm0, %v6637_v17  ;;  %v3694_v35 = vld [vmem:[%s6455_s2 + $0xb8] sm:$0xff] }
 0x8a7   :  { %4231 = vmatprep.subr.mxu0 %v6637_v17 }
 0x8a9   :  { %4229 = vmatmul.mubr.msk.f32.vlgmr.msra.gmra.mxu0 %vm1722_vm4, %v2877_v14  ;;  %v3693_v14 = vld [vmem:[%s6455_s2 + $0xb0] sm:$0xff] }
 0x8aa   :  { %4232 = vmatpush3.msk.msra.mxu0 %vm1334_vm3, %v2661_v20  ;;  %4233 = vmatprep.mubr.msk.f32.mxu0 %vm4466_vm0, %v6637_v17  ;;  %v3692_v20 = vld [vmem:[%s6455_s2 + $0xa8] sm:$0xff] }
 0x8ab   :  { %4236 = vmatprep.subr.mxu0 %v6637_v17 }
 0x8ad   :  { %4234 = vmatmul.mubr.msk.f32.vlgmr.msra.gmra.mxu0 %vm1722_vm4, %v3110_v29  ;;  %v3691_v29 = vld [vmem:[%s6455_s2 + $0xa0] sm:$0xff] }
 0x8ae   :  { %4238 = vmatprep.mubr.msk.f32.mxu0 %vm4466_vm0, %v6637_v17 }
 0x8be   :  { %v2730_v26 = vpop.f32.mrf.mxu1  ;;  %v2801_v5 = vpop.f32.mrf.mxu0 }
 0x8bf   :  { %4237 = vmatpush3.msk.msra.mxu0 %vm1334_vm3, %v2730_v26  ;;  %v3689_v26 = vld [vmem:[%s6455_s2 + $0x90] sm:$0xff] }
 0x8c0   :  { %v2732_v32 = vpop.f32.mrf.mxu1  ;;  %4239 = vmatmul.mubr.msk.f32.vlgmr.msra.gmra.mxu0 %vm1722_vm4, %v2878_v23  ;;  %4241 = vmatprep.subr.mxu0 %v6637_v17  ;;  %v2803_v8 = vpop.f32.mrf.mxu0  ;;  %v3690_v23 = vld [vmem:[%s6455_s2 + $0x98] sm:$0xff] }
 0x8c1   :  { %4242 = vmatpush3.msk.msra.mxu0 %vm1334_vm3, %v2732_v32  ;;  %4243 = vmatprep.mubr.msk.f32.mxu0 %vm4466_vm0, %v6637_v17  ;;  %v3688_v32 = vld [vmem:[%s6455_s2 + $0x88] sm:$0xff] }
 0x8c2   :  { %4246 = vmatprep.subr.mxu0 %v6637_v17 }
 0x8c4   :  { %4244 = vmatmul.mubr.msk.f32.vlgmr.msra.gmra.mxu0 %vm1722_vm4, %v3264_v0 }
 0x8c5   :  { %4247 = vmatpush3.msk.msra.mxu0 %vm1334_vm3, %v2801_v5  ;;  %4248 = vmatprep.mubr.msk.f32.mxu0 %vm4466_vm0, %v6637_v17 }
 0x8c6   :  { %4251 = vmatprep.subr.mxu0 %v6637_v17 }
 0x8c8   :  { %4249 = vmatmul.mubr.msk.f32.vlgmr.msra.gmra.mxu0 %vm1722_vm4, %v2879_v7 }
 0x8c9   :  { %4252 = vmatpush3.msk.msra.mxu0 %vm1334_vm3, %v2803_v8  ;;  %4253 = vmatprep.mubr.msk.f32.mxu0 %vm4466_vm0, %v6637_v17 }
 0x8ca   :  { %4261 = vmatprep.subr.mxu0 %v6637_v17 }
 0x8cc   :  { %4254 = vmatmul.mubr.msk.f32.vlgmr.msra.gmra.mxu0 %vm1722_vm4, %v3418_v38 }
 0x8cd   :  { %4263 = vmatprep.mubr.msk.f32.mxu0 %vm4466_vm0, %v6637_v17 }
 0x8df   :  { %v2872_v11 = vpop.f32.mrf.mxu1 }
 0x8e0   :  { %4257 = vmatpush3.msk.msra.mxu1 %vm1334_vm3, %v2872_v11  ;;  %v3687_v11 = vld [vmem:[%s6455_s2 + $0x80] sm:$0xff] }
 0x8e1   :  { %v4215_v12 = vpop.f32.mrf.mxu1  ;;  %4259 = vmatmul.mubr.msk.f32.vlgmr.msra.gmra.mxu1 %vm1722_vm4, %v2880_v9  ;;  %4266 = vmatprep.subr.mxu1 %v6637_v17  ;;  %v3604_v9 = vld [vmem:[%s6467_s11] sm:$0x7] }
 0x8e2   :  { %4298 = vmatprep.mubr.msk.f32.mxu1 %vm4466_vm0, %v6637_v17  ;;  %4267 = vmatpush3.msra.mxu1 %v3702_v63 }
 0x8e3   :  { %4268 = vmatprep.subr.mxu1 %v6637_v17 }
 0x8e4   :  { %4269 = vmatpush3.msra.mxu1 %v3701_v1 }
 0x8e5   :  { %4270 = vmatprep.subr.mxu1 %v6637_v17 }
 0x961   :  { %v2954_v13 = vpop.f32.mrf.mxu0 }
 0x963   :  { %v4220_v15 = vpop.f32.mrf.mxu0 }
 0x965   :  { %v3029_v16 = vpop.f32.mrf.mxu0 }
 0x966   :  { %v3030_v41 = vadd.f32 %v3029_v16, %v2954_v13 }
 0x967   :  { %v4225_v18 = vpop.f32.mrf.mxu0 }
 0x969   :  { %v3105_v19 = vpop.f32.mrf.mxu0 }
 0x96a   :  { %v3109_v36 = vadd.f32 %v3105_v19, %v3030_v41 }
 0x96b   :  { %v4230_v21 = vpop.f32.mrf.mxu0 }
 0x96d   :  { %v3182_v22 = vpop.f32.mrf.mxu0 }
 0x96e   :  { %v3186_v40 = vadd.f32 %v3182_v22, %v3109_v36 }
 0x96f   :  { %v4235_v24 = vpop.f32.mrf.mxu0 }
 0x980   :  { %v3259_v25 = vpop.f32.mrf.mxu0 }
 0x981   :  { %v3263_v42 = vadd.f32 %v3259_v25, %v3186_v40 }
 0x982   :  { %v4240_v27 = vpop.f32.mrf.mxu0 }
 0x984   :  { %v3336_v30 = vpop.f32.mrf.mxu0 }
 0x985   :  { %v3340_v44 = vadd.f32 %v3336_v30, %v3263_v42 }
 0x986   :  { %v4245_v31 = vpop.f32.mrf.mxu0 }
 0x988   :  { %v3413_v33 = vpop.f32.mrf.mxu0 }
 0x989   :  { %v3417_v45 = vadd.f32 %v3413_v33, %v3340_v44 }
 0x98a   :  { %v4250_v34 = vpop.f32.mrf.mxu0 }
 0x98c   :  { %v3490_v37 = vpop.f32.mrf.mxu0 }
 0x98d   :  { %v3494_v46 = vadd.f32 %v3490_v37, %v3417_v45 }
 0x98e   :  { %v4255_v39 = vpop.f32.mrf.mxu0 }
 0x9a1   :  { %v3567_v47 = vpop.f32.mrf.mxu1 }
 0x9a2   :  { %v3571_v28 = vadd.f32 %v3567_v47, %v3494_v46 }
 0x9a3   :  { %v4260_v50 = vpop.f32.mrf.mxu1 }
 0x9a4   :  { %v3578_v51 = vadd.f32 %v3576_v49, %v3571_v28 }
 0x9a6   :  { %v3579_v52 = vsel %vm1334_vm3, %v3578_v51, 0.0 }
 0x9a7   :  { %3580 = vadd.xlane.f32.xlu0 %v3579_v52 }
 0xa30   :  { %v3581_v53 = vpop.xlane.xlu0 %3580 }
 0xa31   :  { %v3582_v54 = vmul.f32 0.0078125, %v3581_v53 }
 0xa33   :  { %v6372_v55 = vsub.f32 %v3578_v51, %v3582_v54 }
 0xa35   :  { %v3584_v56 = vmul.f32 %v6372_v55, %v6372_v55 }
 0xa37   :  { %v3585_v57 = vsel %vm1334_vm3, %v3584_v56, 0.0 }
 0xa38   :  { %3586 = vadd.xlane.f32.xlu1 %v3585_v57 }
 0xa49   :  { %3599 = vperm.xlu1 %4313, %v6307_v3  }
 0xac1   :  { %v3587_v58 = vpop.xlane.xlu1 %3586 }
 0xac2   :  { %v3588_v59 = vmul.f32 0.0078125, %v3587_v58 }
 0xac4   :  { %v3589_v60 = vadd.f32 1e-05, %v3588_v59 }
 0xac5   :  { %v3600_v5 = vpop.permute.xlu1 %3599 }
 0xac6   :  { %4319 = vrsqrt.f32 %v3589_v60 }
 0xad3   :  { %v4320_v61 = vpop.eup %4319 }
 0xad4   :  { %v3591_v62 = vmul.f32 %v4320_v61, %v6307_v3  ;;  %v3700_v3 = vld [vmem:[%s6455_s2 + $0xe8] sm:$0xff] }
 0xad5   :  { %4271 = vmatpush3.msra.mxu1 %v3700_v3 }
 0xad6   :  { %3594 = vperm.xlu0 %4310, %v3591_v62   ;;  %4272 = vmatprep.subr.mxu1 %v6637_v17 }
 0xad7   :  { %4273 = vmatpush3.msra.mxu1 %v3699_v4 }
 0xad8   :  { %4274 = vmatprep.subr.mxu1 %v6637_v17 }
 0xada   :  { %4314 = vset.pattern.permute.xlu0 %v6666_v43  ;;  %v3698_v43 = vld [vmem:[%s6455_s2 + $0xd8] sm:$0xff] }
 0xadb   :  { %3608 = vperm.xlu0 %4314, %v3605_v2   ;;  %4275 = vmatpush3.msra.mxu1 %v3698_v43 }
 0xadc   :  { %4276 = vmatprep.subr.mxu1 %v6637_v17 }
 0xadd   :  { %4277 = vmatpush3.msra.mxu1 %v3697_v6 }
 0xade   :  { %4278 = vmatprep.subr.mxu1 %v6637_v17 }
 0xadf   :  { %4279 = vmatpush3.msra.mxu1 %v3696_v48 }
 0xae0   :  { %4280 = vmatprep.subr.mxu1 %v6637_v17 }
 0xae1   :  { %4281 = vmatpush3.msra.mxu1 %v3695_v10 }
 0xae2   :  { %4282 = vmatprep.subr.mxu1 %v6637_v17 }
 0xae3   :  { %4283 = vmatpush3.msra.mxu1 %v3694_v35 }
 0xae4   :  { %4284 = vmatprep.subr.mxu1 %v6637_v17 }
 0xae5   :  { %4285 = vmatpush3.msra.mxu1 %v3693_v14 }
 0xae6   :  { %4286 = vmatprep.subr.mxu1 %v6637_v17 }
 0xae7   :  { %4287 = vmatpush3.msra.mxu1 %v3692_v20 }
 0xae8   :  { %4288 = vmatprep.subr.mxu1 %v6637_v17 }
 0xae9   :  { %4289 = vmatpush3.msra.mxu1 %v3691_v29 }
 0xaea   :  { %4290 = vmatprep.subr.mxu1 %v6637_v17 }
 0xaeb   :  { %4291 = vmatpush3.msra.mxu1 %v3690_v23 }
 0xaec   :  { %4292 = vmatprep.subr.mxu1 %v6637_v17 }
 0xaed   :  { %4293 = vmatpush3.msra.mxu1 %v3689_v26 }
 0xaee   :  { %4294 = vmatprep.subr.mxu1 %v6637_v17 }
 0xaef   :  { %4295 = vmatpush3.msra.mxu1 %v3688_v32 }
 0xaf0   :  { %4296 = vmatprep.subr.mxu1 %v6637_v17 }
 0xaf1   :  { %4297 = vmatpush3.msra.mxu1 %v3687_v11 }
 0xb51   :  { %v3595_v0 = vpop.permute.xlu0 %3594 }
 0xb52   :  { %v3597_v7 = vmul.f32 %v3595_v0, %v6372_v55 }
 0xb54   :  { %v3602_v8 = vadd.f32 %v3600_v5, %v3597_v7 }
 0xb56   :  { %v3603_v38 = vmax.f32 %v3602_v8, 0.0  ;;  %v3609_v17 = vpop.permute.xlu0 %3608 }
 0xb58   :  { %4262 = vmatpush3.msk.msra.mxu0 %vm1334_vm3, %v3603_v38 }
 0xb59   :  { %4264 = vmatmul.mubr.msk.f32.vlgmr.msra.gmra.mxu0 %vm1722_vm4, %v3604_v9 }
 0xc19   :  { %v3683_v12 = vpop.f32.mrf.mxu0 }
 0xc1a   :  { %v3684_v13 = vadd.f32 %v3683_v12, %v3609_v17 }
 0xc1b   :  { %v4265_v15 = vpop.f32.mrf.mxu0 }
 0xc1c   :  { %4299 = vmatmul.mubr.f32.vlgmr.msra.gmra.mxu1 %v3684_v13 }
 0xcdc   :  { %v3769_v16 = vpop.f32.mrf.mxu1 }
 0xcdd   :  { %3773 = vst [vmem:[%s6468_s13] sm:$0x7] %v3769_v16 }
 0xcde   :  { %v4300_v18 = vpop.f32.mrf.mxu1 }

</bundles_post_ra>
